<compile_context>
chip_gen: v6e
topology: v6e:2x2x1
jax: 0.10.0
libtpu: 0.0.40
codegen_flags: <defaults>
</compile_context>

<pallas_src>
import numpy as np
import jax
import jax.numpy as jnp
from jax.experimental import pallas as pl
from jax.experimental.pallas import tpu as pltpu

# ----------------------------------------------------------------------------
# KAN configuration (FastKAN / FasterKAN defaults from the reference repos)
# ----------------------------------------------------------------------------
NUM_GRIDS = 8
FASTKAN_GRID = tuple(float(g) for g in np.linspace(-2.0, 2.0, NUM_GRIDS))
FASTKAN_INV_DENOM = float((NUM_GRIDS - 1) / (2.0 - (-2.0)))      # 1/denom = 7/4
FASTERKAN_GRID = tuple(float(g) for g in np.linspace(-1.2, 0.2, NUM_GRIDS))
FASTERKAN_INV_DENOM = 0.5
LN_EPS = 1e-5


# ----------------------------------------------------------------------------
# Single fused Pallas kernel: all heads, all layers, final 3-way sum
# ----------------------------------------------------------------------------
def _make_ensemble_kernel(n_fastkan_heads, n_fk_layers, n_fr_layers):
    """Builds a kernel whose refs are:
       [x, (ln_w, ln_b, packed_w, base_b) * n_fk_layers * n_fastkan_heads,
           (ln_w, ln_b, spline_w)       * n_fr_layers,
        out]"""

    def kernel(*refs):
        x_ref = refs[0]
        o_ref = refs[-1]
        it = iter(refs[1:-1])

        x = x_ref[...].astype(jnp.float32)                        # [tb, H0]

        def layernorm(v, ln_w, ln_b):
            # One-pass statistics: var = max(E[v^2] - mu^2, 0).
            mu = jnp.mean(v, axis=-1, keepdims=True)
            ex2 = jnp.mean(v * v, axis=-1, keepdims=True)
            var = jnp.maximum(ex2 - mu * mu, 0.0)
            return (v - mu) * jax.lax.rsqrt(var + LN_EPS) * ln_w + ln_b

        def fastkan_step(v, lnw_ref, lnb_ref, w_ref, bb_ref):
            # y = [RBF(LN(v)) for all grids | SiLU(v)] @ W_packed + b_base
            ln = layernorm(v, lnw_ref[...], lnb_ref[...])
            z = ln * FASTKAN_INV_DENOM                            # hoist 1/denom
            parts = [jnp.exp(-jnp.square(z - g * FASTKAN_INV_DENOM))
                     for g in FASTKAN_GRID]                       # G x [tb, H]
            parts.append(v * jax.nn.sigmoid(v))                   # SiLU base branch
            # Grid-major lane-concat -> [tb, (G+1)*H]; matches W_packed row order.
            slab = jnp.concatenate(parts, axis=-1).astype(jnp.bfloat16)
            return (jnp.dot(slab, w_ref[...],
                            preferred_element_type=jnp.float32)   # one MXU dot
                    + bb_ref[...])

        def fasterkan_step(v, lnw_ref, lnb_ref, w_ref):
            # y = RSWAF(LN(v)) @ W_spline  (no base branch / bias)
            ln = layernorm(v, lnw_ref[...], lnb_ref[...])
            parts = []
            for g in FASTERKAN_GRID:
                t = jnp.tanh((ln - g) * FASTERKAN_INV_DENOM)
                parts.append(1.0 - t * t)                         # [tb, H]
            slab = jnp.concatenate(parts, axis=-1).astype(jnp.bfloat16)  # [tb, G*H]
            return jnp.dot(slab, w_ref[...], preferred_element_type=jnp.float32)

        acc = None
        for _ in range(n_fastkan_heads):                          # efficient_kan, fast_kan
            h = x
            for _ in range(n_fk_layers):
                h = fastkan_step(h, next(it), next(it), next(it), next(it))
            acc = h if acc is None else acc + h
        h = x
        for _ in range(n_fr_layers):                              # faster_kan
            h = fasterkan_step(h, next(it), next(it), next(it))
        acc = acc + h                                             # fused 3-way sum

        o_ref[...] = acc.astype(o_ref.dtype)

    return kernel


def ensemble_kan_heads(x, params, *, batch_tile=128):
    """Run all three KAN heads + final sum in one pallas_call."""
    fk_heads = [params["efficient_kan"], params["fast_kan"]]
    fr_layers = params["faster_kan"]

    weights = []
    for head in fk_heads:
        for layer in head:
            weights += [layer["ln_w"], layer["ln_b"],
                        layer["packed_w"], layer["base_b"]]
    for layer in fr_layers:
        weights += [layer["ln_w"], layer["ln_b"], layer["spline_w"]]

    B, H = x.shape
    out_dim = fk_heads[0][-1]["packed_w"].shape[-1]

    # Tile the batch axis when it divides evenly (megacore-parallel grid,
    # bounded per-step VMEM); otherwise run the whole batch in one block.
    tb = batch_tile if (B % batch_tile == 0) else B
    grid = (B // tb,)

    x_spec = pl.BlockSpec((tb, H), lambda i: (i, 0))
    out_spec = pl.BlockSpec((tb, out_dim), lambda i: (i, 0))
    # Weights: full-array VMEM blocks; block index is constant across the grid,
    # so the pipeline skips re-fetching them on every batch tile.
    w_specs = [pl.BlockSpec(w.shape, lambda i: (0, 0)) for w in weights]

    kernel = _make_ensemble_kernel(len(fk_heads), len(fk_heads[0]), len(fr_layers))

    return pl.pallas_call(
        kernel,
        out_shape=jax.ShapeDtypeStruct((B, out_dim), jnp.float32),
        grid_spec=pltpu.PrefetchScalarGridSpec(
            num_scalar_prefetch=0,
            grid=grid,
            in_specs=[x_spec] + w_specs,
            out_specs=out_spec,
        ),
        compiler_params=pltpu.CompilerParams(
            dimension_semantics=("parallel",)),
    )(x, *weights)


# ----------------------------------------------------------------------------
# Pure-JAX reference (same math, same bf16 packed weights) for validation
# ----------------------------------------------------------------------------
def ensemble_kan_heads_ref(x, params):
    def layernorm(v, w, b):
        mu = jnp.mean(v, axis=-1, keepdims=True)
        var = jnp.mean(jnp.square(v - mu), axis=-1, keepdims=True)
        return (v - mu) * jax.lax.rsqrt(var + LN_EPS) * w + b

    grid_fk = jnp.asarray(FASTKAN_GRID, jnp.float32)
    grid_fr = jnp.asarray(FASTERKAN_GRID, jnp.float32)

    def fastkan_head(v, layers):
        for layer in layers:
            ln = layernorm(v, layer["ln_w"], layer["ln_b"])
            phi = jnp.exp(-jnp.square(
                (ln[:, None, :] - grid_fk[None, :, None]) * FASTKAN_INV_DENOM))
            slab = jnp.concatenate(
                [phi.reshape(phi.shape[0], -1), v * jax.nn.sigmoid(v)],
                axis=-1).astype(jnp.bfloat16)
            v = (jnp.dot(slab, layer["packed_w"],
                         preferred_element_type=jnp.float32) + layer["base_b"])
        return v

    def fasterkan_head(v, layers):
        for layer in layers:
            ln = layernorm(v, layer["ln_w"], layer["ln_b"])
            t = jnp.tanh((ln[:, None, :] - grid_fr[None, :, None])
                         * FASTERKAN_INV_DENOM)
            slab = (1.0 - t * t).reshape(t.shape[0], -1).astype(jnp.bfloat16)
            v = jnp.dot(slab, layer["spline_w"], preferred_element_type=jnp.float32)
        return v

    return (fastkan_head(x, params["efficient_kan"])
            + fastkan_head(x, params["fast_kan"])
            + fasterkan_head(x, params["faster_kan"]))


# ----------------------------------------------------------------------------
# Parameter initialization (deterministic, synthetic) — weights pre-packed
# ----------------------------------------------------------------------------
def init_fastkan_params(key, hiddens_layer):
    layers = []
    for i, (din, dout) in enumerate(zip(hiddens_layer[:-1], hiddens_layer[1:])):
        k = jax.random.fold_in(key, i)
        k_spline, k_base = jax.random.split(k)
        spline_w = (0.1 / np.sqrt(din * NUM_GRIDS)) * jax.random.normal(
            k_spline, (NUM_GRIDS, din, dout), jnp.float32)
        base_w = (1.0 / np.sqrt(din)) * jax.random.normal(
            k_base, (din, dout), jnp.float32)
        # Grid-major packing: spline row index = g*din + h, then the SiLU base
        # block.  This MUST match the kernel's lane-concat order (it does).
        packed_w = jnp.concatenate(
            [spline_w.reshape(NUM_GRIDS * din, dout), base_w], axis=0
        ).astype(jnp.bfloat16)                                    # [(G+1)*din, dout]
        layers.append(dict(
            ln_w=jnp.ones((1, din), jnp.float32),
            ln_b=jnp.zeros((1, din), jnp.float32),
            packed_w=packed_w,
            base_b=jnp.zeros((1, dout), jnp.float32),
        ))
    return layers


def init_fasterkan_params(key, hiddens_layer):
    layers = []
    for i, (din, dout) in enumerate(zip(hiddens_layer[:-1], hiddens_layer[1:])):
        k = jax.random.fold_in(key, i)
        spline_w = (0.667 / np.sqrt(din * NUM_GRIDS)) * jax.random.normal(
            k, (NUM_GRIDS, din, dout), jnp.float32)
        layers.append(dict(
            ln_w=jnp.ones((1, din), jnp.float32),
            ln_b=jnp.zeros((1, din), jnp.float32),
            spline_w=spline_w.reshape(NUM_GRIDS * din, dout).astype(jnp.bfloat16),
        ))
    return layers


def init_backbone_params(key, vocab_size, hidden):
    k_emb, k_pool = jax.random.split(key)
    return dict(
        emb=0.02 * jax.random.normal(k_emb, (vocab_size, hidden), jnp.float32),
        pool_w=(1.0 / np.sqrt(hidden)) *
               jax.random.normal(k_pool, (hidden, hidden), jnp.float32),
        pool_b=jnp.zeros((hidden,), jnp.float32),
    )


# ----------------------------------------------------------------------------
# Full forward: TransformerEnsembleKAN
# ----------------------------------------------------------------------------
def _backbone_features(input_ids, attention_mask, bb):
    # TODO(synk): the pretrained HuggingFace AutoModel backbone cannot be
    # reproduced here; this is a deterministic synthetic stand-in producing a
    # pooled [B, H] feature (embedding lookup -> masked mean pool -> tanh dense),
    # matching the `_, x = self.model(...)` pooler-output contract.
    tok = bb["emb"][input_ids]                                   # [B, S, H] gather (glue)
    mask = attention_mask.astype(jnp.float32)[..., None]         # [B, S, 1]
    pooled = jnp.sum(tok * mask, axis=1) / jnp.maximum(jnp.sum(mask, axis=1), 1.0)
    return jnp.tanh(pooled @ bb["pool_w"] + bb["pool_b"])        # [B, H]


@jax.jit
def transformer_ensemble_kan_forward(input_ids, attention_mask, params):
    x = _backbone_features(input_ids, attention_mask, params["backbone"])
    # All three KAN heads + the final x1 + x2 + x3 in ONE fused Pallas kernel.
    return ensemble_kan_heads(x, params)                         # [B, hiddens_layer[-1]]


# ----------------------------------------------------------------------------
# Demo
# ----------------------------------------------------------------------------
if __name__ == "__main__":
    B, S = 2, 8
    VOCAB = 100
    hiddens_layer = [32, 16, 8]   # backbone hidden -> KAN hidden -> output

    key = jax.random.PRNGKey(0)
    k_bb, k_k1, k_k2, k_k3, k_ids = jax.random.split(key, 5)

    params = dict(
        backbone=init_backbone_params(k_bb, VOCAB, hiddens_layer[0]),
        efficient_kan=init_fastkan_params(k_k1, hiddens_layer),
        fast_kan=init_fastkan_params(k_k2, hiddens_layer),
        faster_kan=init_fasterkan_params(k_k3, hiddens_layer),
    )

    input_ids = jax.random.randint(k_ids, (B, S), 0, VOCAB, dtype=jnp.int32)
    attention_mask = jnp.concatenate(
        [jnp.ones((B, S - 2), jnp.int32), jnp.zeros((B, 2), jnp.int32)], axis=1)

    out = transformer_ensemble_kan_forward(input_ids, attention_mask, params)
    out = jax.block_until_ready(out)

    # Pure-JAX reference check for the fused KAN ensemble.
    x_feat = _backbone_features(input_ids, attention_mask, params["backbone"])
    ref = ensemble_kan_heads_ref(x_feat, params)

    assert out.shape == (B, hiddens_layer[-1])
    assert bool(jnp.all(jnp.isfinite(out)))
    assert bool(jnp.allclose(out, ref, rtol=2e-2, atol=2e-2))
    print("KERNEL_OK")
</pallas_src>

<mosaic_0001>
module attributes {stable_mosaic.version = 11 : i64} {
  func.func @kernel(%arg0: i32, %arg1: memref<2x32xf32, #tpu.memory_space<vmem>>, %arg2: memref<1x32xf32, #tpu.memory_space<vmem>>, %arg3: memref<1x32xf32, #tpu.memory_space<vmem>>, %arg4: memref<288x16xbf16, #tpu.memory_space<vmem>>, %arg5: memref<1x16xf32, #tpu.memory_space<vmem>>, %arg6: memref<1x16xf32, #tpu.memory_space<vmem>>, %arg7: memref<1x16xf32, #tpu.memory_space<vmem>>, %arg8: memref<144x8xbf16, #tpu.memory_space<vmem>>, %arg9: memref<1x8xf32, #tpu.memory_space<vmem>>, %arg10: memref<1x32xf32, #tpu.memory_space<vmem>>, %arg11: memref<1x32xf32, #tpu.memory_space<vmem>>, %arg12: memref<288x16xbf16, #tpu.memory_space<vmem>>, %arg13: memref<1x16xf32, #tpu.memory_space<vmem>>, %arg14: memref<1x16xf32, #tpu.memory_space<vmem>>, %arg15: memref<1x16xf32, #tpu.memory_space<vmem>>, %arg16: memref<144x8xbf16, #tpu.memory_space<vmem>>, %arg17: memref<1x8xf32, #tpu.memory_space<vmem>>, %arg18: memref<1x32xf32, #tpu.memory_space<vmem>>, %arg19: memref<1x32xf32, #tpu.memory_space<vmem>>, %arg20: memref<256x16xbf16, #tpu.memory_space<vmem>>, %arg21: memref<1x16xf32, #tpu.memory_space<vmem>>, %arg22: memref<1x16xf32, #tpu.memory_space<vmem>>, %arg23: memref<128x8xbf16, #tpu.memory_space<vmem>>, %arg24: memref<2x8xf32, #tpu.memory_space<vmem>>) attributes {dimension_semantics = [#tpu.dimension_semantics<parallel>], iteration_bounds = array<i64: 1>, scalar_prefetch = 0 : i64, scratch_operands = 0 : i64, tpu.core_type = #tpu.core_type<tc>, window_params = [{transform_indices = @transform_0, window_bounds = array<i64: 2, 32>}, {pipeline_mode = #tpu.pipeline_mode<synchronous>, transform_indices = @transform_1, window_bounds = array<i64: 1, 32>}, {pipeline_mode = #tpu.pipeline_mode<synchronous>, transform_indices = @transform_2, window_bounds = array<i64: 1, 32>}, {pipeline_mode = #tpu.pipeline_mode<synchronous>, transform_indices = @transform_3, window_bounds = array<i64: 288, 16>}, {pipeline_mode = #tpu.pipeline_mode<synchronous>, transform_indices = @transform_4, window_bounds = array<i64: 1, 16>}, {pipeline_mode = #tpu.pipeline_mode<synchronous>, transform_indices = @transform_5, window_bounds = array<i64: 1, 16>}, {pipeline_mode = #tpu.pipeline_mode<synchronous>, transform_indices = @transform_6, window_bounds = array<i64: 1, 16>}, {pipeline_mode = #tpu.pipeline_mode<synchronous>, transform_indices = @transform_7, window_bounds = array<i64: 144, 8>}, {pipeline_mode = #tpu.pipeline_mode<synchronous>, transform_indices = @transform_8, window_bounds = array<i64: 1, 8>}, {pipeline_mode = #tpu.pipeline_mode<synchronous>, transform_indices = @transform_9, window_bounds = array<i64: 1, 32>}, {pipeline_mode = #tpu.pipeline_mode<synchronous>, transform_indices = @transform_10, window_bounds = array<i64: 1, 32>}, {pipeline_mode = #tpu.pipeline_mode<synchronous>, transform_indices = @transform_11, window_bounds = array<i64: 288, 16>}, {pipeline_mode = #tpu.pipeline_mode<synchronous>, transform_indices = @transform_12, window_bounds = array<i64: 1, 16>}, {pipeline_mode = #tpu.pipeline_mode<synchronous>, transform_indices = @transform_13, window_bounds = array<i64: 1, 16>}, {pipeline_mode = #tpu.pipeline_mode<synchronous>, transform_indices = @transform_14, window_bounds = array<i64: 1, 16>}, {pipeline_mode = #tpu.pipeline_mode<synchronous>, transform_indices = @transform_15, window_bounds = array<i64: 144, 8>}, {pipeline_mode = #tpu.pipeline_mode<synchronous>, transform_indices = @transform_16, window_bounds = array<i64: 1, 8>}, {pipeline_mode = #tpu.pipeline_mode<synchronous>, transform_indices = @transform_17, window_bounds = array<i64: 1, 32>}, {pipeline_mode = #tpu.pipeline_mode<synchronous>, transform_indices = @transform_18, window_bounds = array<i64: 1, 32>}, {pipeline_mode = #tpu.pipeline_mode<synchronous>, transform_indices = @transform_19, window_bounds = array<i64: 256, 16>}, {pipeline_mode = #tpu.pipeline_mode<synchronous>, transform_indices = @transform_20, window_bounds = array<i64: 1, 16>}, {pipeline_mode = #tpu.pipeline_mode<synchronous>, transform_indices = @transform_21, window_bounds = array<i64: 1, 16>}, {pipeline_mode = #tpu.pipeline_mode<synchronous>, transform_indices = @transform_22, window_bounds = array<i64: 128, 8>}, {transform_indices = @transform_23, window_bounds = array<i64: 2, 8>}]} {
    %c0 = arith.constant 0 : index
    %c0_0 = arith.constant 0 : index
    %0 = vector.load %arg1[%c0, %c0_0] : memref<2x32xf32, #tpu.memory_space<vmem>>, vector<2x32xf32>
    %c0_1 = arith.constant 0 : index
    %c0_2 = arith.constant 0 : index
    %1 = vector.load %arg2[%c0_1, %c0_2] : memref<1x32xf32, #tpu.memory_space<vmem>>, vector<1x32xf32>
    %c0_3 = arith.constant 0 : index
    %c0_4 = arith.constant 0 : index
    %2 = vector.load %arg3[%c0_3, %c0_4] : memref<1x32xf32, #tpu.memory_space<vmem>>, vector<1x32xf32>
    %cst = arith.constant dense<0.000000e+00> : vector<2xf32>
    %3 = vector.multi_reduction <add>, %0, %cst [1] : vector<2x32xf32> to vector<2xf32>
    %4 = vector.shape_cast %3 : vector<2xf32> to vector<2x1xf32>
    %cst_5 = arith.constant 3.200000e+01 : f32
    %5 = vector.broadcast %cst_5 : f32 to vector<2x1xf32>
    %6 = arith.divf %4, %5 : vector<2x1xf32>
    %7 = arith.mulf %0, %0 : vector<2x32xf32>
    %cst_6 = arith.constant dense<0.000000e+00> : vector<2xf32>
    %8 = vector.multi_reduction <add>, %7, %cst_6 [1] : vector<2x32xf32> to vector<2xf32>
    %9 = vector.shape_cast %8 : vector<2xf32> to vector<2x1xf32>
    %cst_7 = arith.constant 3.200000e+01 : f32
    %10 = vector.broadcast %cst_7 : f32 to vector<2x1xf32>
    %11 = arith.divf %9, %10 : vector<2x1xf32>
    %12 = arith.mulf %6, %6 : vector<2x1xf32>
    %13 = arith.subf %11, %12 : vector<2x1xf32>
    %cst_8 = arith.constant 0.000000e+00 : f32
    %14 = vector.broadcast %cst_8 : f32 to vector<2x1xf32>
    %15 = arith.maximumf %13, %14 : vector<2x1xf32>
    %16 = vector.broadcast %6 : vector<2x1xf32> to vector<2x32xf32>
    %17 = arith.subf %0, %16 : vector<2x32xf32>
    %cst_9 = arith.constant 9.99999974E-6 : f32
    %18 = vector.broadcast %cst_9 : f32 to vector<2x1xf32>
    %19 = arith.addf %15, %18 : vector<2x1xf32>
    %20 = math.rsqrt %19 : vector<2x1xf32>
    %21 = vector.broadcast %20 : vector<2x1xf32> to vector<2x32xf32>
    %22 = arith.mulf %17, %21 : vector<2x32xf32>
    %23 = vector.broadcast %1 : vector<1x32xf32> to vector<2x32xf32>
    %24 = arith.mulf %22, %23 : vector<2x32xf32>
    %25 = vector.broadcast %2 : vector<1x32xf32> to vector<2x32xf32>
    %26 = arith.addf %24, %25 : vector<2x32xf32>
    %cst_10 = arith.constant 1.750000e+00 : f32
    %27 = vector.broadcast %cst_10 : f32 to vector<2x32xf32>
    %28 = arith.mulf %26, %27 : vector<2x32xf32>
    %cst_11 = arith.constant -3.500000e+00 : f32
    %29 = vector.broadcast %cst_11 : f32 to vector<2x32xf32>
    %30 = arith.subf %28, %29 : vector<2x32xf32>
    %31 = arith.mulf %30, %30 : vector<2x32xf32>
    %cst_12 = arith.constant 0.000000e+00 : f32
    %32 = vector.broadcast %cst_12 : f32 to vector<2x32xf32>
    %33 = arith.subf %32, %31 : vector<2x32xf32>
    %34 = math.exp %33 : vector<2x32xf32>
    %cst_13 = arith.constant -2.500000e+00 : f32
    %35 = vector.broadcast %cst_13 : f32 to vector<2x32xf32>
    %36 = arith.subf %28, %35 : vector<2x32xf32>
    %37 = arith.mulf %36, %36 : vector<2x32xf32>
    %cst_14 = arith.constant 0.000000e+00 : f32
    %38 = vector.broadcast %cst_14 : f32 to vector<2x32xf32>
    %39 = arith.subf %38, %37 : vector<2x32xf32>
    %40 = math.exp %39 : vector<2x32xf32>
    %cst_15 = arith.constant -1.500000e+00 : f32
    %41 = vector.broadcast %cst_15 : f32 to vector<2x32xf32>
    %42 = arith.subf %28, %41 : vector<2x32xf32>
    %43 = arith.mulf %42, %42 : vector<2x32xf32>
    %cst_16 = arith.constant 0.000000e+00 : f32
    %44 = vector.broadcast %cst_16 : f32 to vector<2x32xf32>
    %45 = arith.subf %44, %43 : vector<2x32xf32>
    %46 = math.exp %45 : vector<2x32xf32>
    %cst_17 = arith.constant -5.000000e-01 : f32
    %47 = vector.broadcast %cst_17 : f32 to vector<2x32xf32>
    %48 = arith.subf %28, %47 : vector<2x32xf32>
    %49 = arith.mulf %48, %48 : vector<2x32xf32>
    %cst_18 = arith.constant 0.000000e+00 : f32
    %50 = vector.broadcast %cst_18 : f32 to vector<2x32xf32>
    %51 = arith.subf %50, %49 : vector<2x32xf32>
    %52 = math.exp %51 : vector<2x32xf32>
    %cst_19 = arith.constant 5.000000e-01 : f32
    %53 = vector.broadcast %cst_19 : f32 to vector<2x32xf32>
    %54 = arith.subf %28, %53 : vector<2x32xf32>
    %55 = arith.mulf %54, %54 : vector<2x32xf32>
    %cst_20 = arith.constant 0.000000e+00 : f32
    %56 = vector.broadcast %cst_20 : f32 to vector<2x32xf32>
    %57 = arith.subf %56, %55 : vector<2x32xf32>
    %58 = math.exp %57 : vector<2x32xf32>
    %cst_21 = arith.constant 1.500000e+00 : f32
    %59 = vector.broadcast %cst_21 : f32 to vector<2x32xf32>
    %60 = arith.subf %28, %59 : vector<2x32xf32>
    %61 = arith.mulf %60, %60 : vector<2x32xf32>
    %cst_22 = arith.constant 0.000000e+00 : f32
    %62 = vector.broadcast %cst_22 : f32 to vector<2x32xf32>
    %63 = arith.subf %62, %61 : vector<2x32xf32>
    %64 = math.exp %63 : vector<2x32xf32>
    %cst_23 = arith.constant 2.500000e+00 : f32
    %65 = vector.broadcast %cst_23 : f32 to vector<2x32xf32>
    %66 = arith.subf %28, %65 : vector<2x32xf32>
    %67 = arith.mulf %66, %66 : vector<2x32xf32>
    %cst_24 = arith.constant 0.000000e+00 : f32
    %68 = vector.broadcast %cst_24 : f32 to vector<2x32xf32>
    %69 = arith.subf %68, %67 : vector<2x32xf32>
    %70 = math.exp %69 : vector<2x32xf32>
    %cst_25 = arith.constant 3.500000e+00 : f32
    %71 = vector.broadcast %cst_25 : f32 to vector<2x32xf32>
    %72 = arith.subf %28, %71 : vector<2x32xf32>
    %73 = arith.mulf %72, %72 : vector<2x32xf32>
    %cst_26 = arith.constant 0.000000e+00 : f32
    %74 = vector.broadcast %cst_26 : f32 to vector<2x32xf32>
    %75 = arith.subf %74, %73 : vector<2x32xf32>
    %76 = math.exp %75 : vector<2x32xf32>
    %77 = arith.negf %0 : vector<2x32xf32>
    %78 = math.exp %77 : vector<2x32xf32>
    %cst_27 = arith.constant 1.000000e+00 : f32
    %79 = vector.broadcast %cst_27 : f32 to vector<2x32xf32>
    %80 = arith.addf %79, %78 : vector<2x32xf32>
    %81 = arith.divf %79, %80 : vector<2x32xf32>
    %82 = arith.mulf %0, %81 : vector<2x32xf32>
    %83 = tpu.concatenate %34, %40, %46, %52, %58, %64, %70, %76, %82 in 1 : vector<2x32xf32>, vector<2x32xf32>, vector<2x32xf32>, vector<2x32xf32>, vector<2x32xf32>, vector<2x32xf32>, vector<2x32xf32>, vector<2x32xf32>, vector<2x32xf32> -> vector<2x288xf32>
    %84 = arith.truncf %83 : vector<2x288xf32> to vector<2x288xbf16>
    %c0_28 = arith.constant 0 : index
    %c0_29 = arith.constant 0 : index
    %85 = vector.load %arg4[%c0_28, %c0_29] : memref<288x16xbf16, #tpu.memory_space<vmem>>, vector<288x16xbf16>
    %cst_30 = arith.constant dense<0.000000e+00> : vector<2x16xf32>
    %86 = tpu.matmul %84, %85, %cst_30 {dimension_numbers = #tpu.dot_dimension_numbers<[1], [0], [0], [1], [0, 0, 1, 1], [], []>} : vector<2x288xbf16>, vector<288x16xbf16>, vector<2x16xf32> -> vector<2x16xf32>
    %c0_31 = arith.constant 0 : index
    %c0_32 = arith.constant 0 : index
    %87 = vector.load %arg5[%c0_31, %c0_32] : memref<1x16xf32, #tpu.memory_space<vmem>>, vector<1x16xf32>
    %88 = vector.broadcast %87 : vector<1x16xf32> to vector<2x16xf32>
    %89 = arith.addf %86, %88 : vector<2x16xf32>
    %c0_33 = arith.constant 0 : index
    %c0_34 = arith.constant 0 : index
    %90 = vector.load %arg6[%c0_33, %c0_34] : memref<1x16xf32, #tpu.memory_space<vmem>>, vector<1x16xf32>
    %c0_35 = arith.constant 0 : index
    %c0_36 = arith.constant 0 : index
    %91 = vector.load %arg7[%c0_35, %c0_36] : memref<1x16xf32, #tpu.memory_space<vmem>>, vector<1x16xf32>
    %cst_37 = arith.constant dense<0.000000e+00> : vector<2xf32>
    %92 = vector.multi_reduction <add>, %89, %cst_37 [1] : vector<2x16xf32> to vector<2xf32>
    %93 = vector.shape_cast %92 : vector<2xf32> to vector<2x1xf32>
    %cst_38 = arith.constant 1.600000e+01 : f32
    %94 = vector.broadcast %cst_38 : f32 to vector<2x1xf32>
    %95 = arith.divf %93, %94 : vector<2x1xf32>
    %96 = arith.mulf %89, %89 : vector<2x16xf32>
    %cst_39 = arith.constant dense<0.000000e+00> : vector<2xf32>
    %97 = vector.multi_reduction <add>, %96, %cst_39 [1] : vector<2x16xf32> to vector<2xf32>
    %98 = vector.shape_cast %97 : vector<2xf32> to vector<2x1xf32>
    %cst_40 = arith.constant 1.600000e+01 : f32
    %99 = vector.broadcast %cst_40 : f32 to vector<2x1xf32>
    %100 = arith.divf %98, %99 : vector<2x1xf32>
    %101 = arith.mulf %95, %95 : vector<2x1xf32>
    %102 = arith.subf %100, %101 : vector<2x1xf32>
    %cst_41 = arith.constant 0.000000e+00 : f32
    %103 = vector.broadcast %cst_41 : f32 to vector<2x1xf32>
    %104 = arith.maximumf %102, %103 : vector<2x1xf32>
    %105 = vector.broadcast %95 : vector<2x1xf32> to vector<2x16xf32>
    %106 = arith.subf %89, %105 : vector<2x16xf32>
    %cst_42 = arith.constant 9.99999974E-6 : f32
    %107 = vector.broadcast %cst_42 : f32 to vector<2x1xf32>
    %108 = arith.addf %104, %107 : vector<2x1xf32>
    %109 = math.rsqrt %108 : vector<2x1xf32>
    %110 = vector.broadcast %109 : vector<2x1xf32> to vector<2x16xf32>
    %111 = arith.mulf %106, %110 : vector<2x16xf32>
    %112 = vector.broadcast %90 : vector<1x16xf32> to vector<2x16xf32>
    %113 = arith.mulf %111, %112 : vector<2x16xf32>
    %114 = vector.broadcast %91 : vector<1x16xf32> to vector<2x16xf32>
    %115 = arith.addf %113, %114 : vector<2x16xf32>
    %cst_43 = arith.constant 1.750000e+00 : f32
    %116 = vector.broadcast %cst_43 : f32 to vector<2x16xf32>
    %117 = arith.mulf %115, %116 : vector<2x16xf32>
    %cst_44 = arith.constant -3.500000e+00 : f32
    %118 = vector.broadcast %cst_44 : f32 to vector<2x16xf32>
    %119 = arith.subf %117, %118 : vector<2x16xf32>
    %120 = arith.mulf %119, %119 : vector<2x16xf32>
    %cst_45 = arith.constant 0.000000e+00 : f32
    %121 = vector.broadcast %cst_45 : f32 to vector<2x16xf32>
    %122 = arith.subf %121, %120 : vector<2x16xf32>
    %123 = math.exp %122 : vector<2x16xf32>
    %cst_46 = arith.constant -2.500000e+00 : f32
    %124 = vector.broadcast %cst_46 : f32 to vector<2x16xf32>
    %125 = arith.subf %117, %124 : vector<2x16xf32>
    %126 = arith.mulf %125, %125 : vector<2x16xf32>
    %cst_47 = arith.constant 0.000000e+00 : f32
    %127 = vector.broadcast %cst_47 : f32 to vector<2x16xf32>
    %128 = arith.subf %127, %126 : vector<2x16xf32>
    %129 = math.exp %128 : vector<2x16xf32>
    %cst_48 = arith.constant -1.500000e+00 : f32
    %130 = vector.broadcast %cst_48 : f32 to vector<2x16xf32>
    %131 = arith.subf %117, %130 : vector<2x16xf32>
    %132 = arith.mulf %131, %131 : vector<2x16xf32>
    %cst_49 = arith.constant 0.000000e+00 : f32
    %133 = vector.broadcast %cst_49 : f32 to vector<2x16xf32>
    %134 = arith.subf %133, %132 : vector<2x16xf32>
    %135 = math.exp %134 : vector<2x16xf32>
    %cst_50 = arith.constant -5.000000e-01 : f32
    %136 = vector.broadcast %cst_50 : f32 to vector<2x16xf32>
    %137 = arith.subf %117, %136 : vector<2x16xf32>
    %138 = arith.mulf %137, %137 : vector<2x16xf32>
    %cst_51 = arith.constant 0.000000e+00 : f32
    %139 = vector.broadcast %cst_51 : f32 to vector<2x16xf32>
    %140 = arith.subf %139, %138 : vector<2x16xf32>
    %141 = math.exp %140 : vector<2x16xf32>
    %cst_52 = arith.constant 5.000000e-01 : f32
    %142 = vector.broadcast %cst_52 : f32 to vector<2x16xf32>
    %143 = arith.subf %117, %142 : vector<2x16xf32>
    %144 = arith.mulf %143, %143 : vector<2x16xf32>
    %cst_53 = arith.constant 0.000000e+00 : f32
    %145 = vector.broadcast %cst_53 : f32 to vector<2x16xf32>
    %146 = arith.subf %145, %144 : vector<2x16xf32>
    %147 = math.exp %146 : vector<2x16xf32>
    %cst_54 = arith.constant 1.500000e+00 : f32
    %148 = vector.broadcast %cst_54 : f32 to vector<2x16xf32>
    %149 = arith.subf %117, %148 : vector<2x16xf32>
    %150 = arith.mulf %149, %149 : vector<2x16xf32>
    %cst_55 = arith.constant 0.000000e+00 : f32
    %151 = vector.broadcast %cst_55 : f32 to vector<2x16xf32>
    %152 = arith.subf %151, %150 : vector<2x16xf32>
    %153 = math.exp %152 : vector<2x16xf32>
    %cst_56 = arith.constant 2.500000e+00 : f32
    %154 = vector.broadcast %cst_56 : f32 to vector<2x16xf32>
    %155 = arith.subf %117, %154 : vector<2x16xf32>
    %156 = arith.mulf %155, %155 : vector<2x16xf32>
    %cst_57 = arith.constant 0.000000e+00 : f32
    %157 = vector.broadcast %cst_57 : f32 to vector<2x16xf32>
    %158 = arith.subf %157, %156 : vector<2x16xf32>
    %159 = math.exp %158 : vector<2x16xf32>
    %cst_58 = arith.constant 3.500000e+00 : f32
    %160 = vector.broadcast %cst_58 : f32 to vector<2x16xf32>
    %161 = arith.subf %117, %160 : vector<2x16xf32>
    %162 = arith.mulf %161, %161 : vector<2x16xf32>
    %cst_59 = arith.constant 0.000000e+00 : f32
    %163 = vector.broadcast %cst_59 : f32 to vector<2x16xf32>
    %164 = arith.subf %163, %162 : vector<2x16xf32>
    %165 = math.exp %164 : vector<2x16xf32>
    %166 = arith.negf %89 : vector<2x16xf32>
    %167 = math.exp %166 : vector<2x16xf32>
    %cst_60 = arith.constant 1.000000e+00 : f32
    %168 = vector.broadcast %cst_60 : f32 to vector<2x16xf32>
    %169 = arith.addf %168, %167 : vector<2x16xf32>
    %170 = arith.divf %168, %169 : vector<2x16xf32>
    %171 = arith.mulf %89, %170 : vector<2x16xf32>
    %172 = tpu.concatenate %123, %129, %135, %141, %147, %153, %159, %165, %171 in 1 : vector<2x16xf32>, vector<2x16xf32>, vector<2x16xf32>, vector<2x16xf32>, vector<2x16xf32>, vector<2x16xf32>, vector<2x16xf32>, vector<2x16xf32>, vector<2x16xf32> -> vector<2x144xf32>
    %173 = arith.truncf %172 : vector<2x144xf32> to vector<2x144xbf16>
    %c0_61 = arith.constant 0 : index
    %c0_62 = arith.constant 0 : index
    %174 = vector.load %arg8[%c0_61, %c0_62] : memref<144x8xbf16, #tpu.memory_space<vmem>>, vector<144x8xbf16>
    %cst_63 = arith.constant dense<0.000000e+00> : vector<2x8xf32>
    %175 = tpu.matmul %173, %174, %cst_63 {dimension_numbers = #tpu.dot_dimension_numbers<[1], [0], [0], [1], [0, 0, 1, 1], [], []>} : vector<2x144xbf16>, vector<144x8xbf16>, vector<2x8xf32> -> vector<2x8xf32>
    %c0_64 = arith.constant 0 : index
    %c0_65 = arith.constant 0 : index
    %176 = vector.load %arg9[%c0_64, %c0_65] : memref<1x8xf32, #tpu.memory_space<vmem>>, vector<1x8xf32>
    %177 = vector.broadcast %176 : vector<1x8xf32> to vector<2x8xf32>
    %178 = arith.addf %175, %177 : vector<2x8xf32>
    %c0_66 = arith.constant 0 : index
    %c0_67 = arith.constant 0 : index
    %179 = vector.load %arg10[%c0_66, %c0_67] : memref<1x32xf32, #tpu.memory_space<vmem>>, vector<1x32xf32>
    %c0_68 = arith.constant 0 : index
    %c0_69 = arith.constant 0 : index
    %180 = vector.load %arg11[%c0_68, %c0_69] : memref<1x32xf32, #tpu.memory_space<vmem>>, vector<1x32xf32>
    %cst_70 = arith.constant dense<0.000000e+00> : vector<2xf32>
    %181 = vector.multi_reduction <add>, %0, %cst_70 [1] : vector<2x32xf32> to vector<2xf32>
    %182 = vector.shape_cast %181 : vector<2xf32> to vector<2x1xf32>
    %cst_71 = arith.constant 3.200000e+01 : f32
    %183 = vector.broadcast %cst_71 : f32 to vector<2x1xf32>
    %184 = arith.divf %182, %183 : vector<2x1xf32>
    %185 = arith.mulf %0, %0 : vector<2x32xf32>
    %cst_72 = arith.constant dense<0.000000e+00> : vector<2xf32>
    %186 = vector.multi_reduction <add>, %185, %cst_72 [1] : vector<2x32xf32> to vector<2xf32>
    %187 = vector.shape_cast %186 : vector<2xf32> to vector<2x1xf32>
    %cst_73 = arith.constant 3.200000e+01 : f32
    %188 = vector.broadcast %cst_73 : f32 to vector<2x1xf32>
    %189 = arith.divf %187, %188 : vector<2x1xf32>
    %190 = arith.mulf %184, %184 : vector<2x1xf32>
    %191 = arith.subf %189, %190 : vector<2x1xf32>
    %cst_74 = arith.constant 0.000000e+00 : f32
    %192 = vector.broadcast %cst_74 : f32 to vector<2x1xf32>
    %193 = arith.maximumf %191, %192 : vector<2x1xf32>
    %194 = vector.broadcast %184 : vector<2x1xf32> to vector<2x32xf32>
    %195 = arith.subf %0, %194 : vector<2x32xf32>
    %cst_75 = arith.constant 9.99999974E-6 : f32
    %196 = vector.broadcast %cst_75 : f32 to vector<2x1xf32>
    %197 = arith.addf %193, %196 : vector<2x1xf32>
    %198 = math.rsqrt %197 : vector<2x1xf32>
    %199 = vector.broadcast %198 : vector<2x1xf32> to vector<2x32xf32>
    %200 = arith.mulf %195, %199 : vector<2x32xf32>
    %201 = vector.broadcast %179 : vector<1x32xf32> to vector<2x32xf32>
    %202 = arith.mulf %200, %201 : vector<2x32xf32>
    %203 = vector.broadcast %180 : vector<1x32xf32> to vector<2x32xf32>
    %204 = arith.addf %202, %203 : vector<2x32xf32>
    %cst_76 = arith.constant 1.750000e+00 : f32
    %205 = vector.broadcast %cst_76 : f32 to vector<2x32xf32>
    %206 = arith.mulf %204, %205 : vector<2x32xf32>
    %cst_77 = arith.constant -3.500000e+00 : f32
    %207 = vector.broadcast %cst_77 : f32 to vector<2x32xf32>
    %208 = arith.subf %206, %207 : vector<2x32xf32>
    %209 = arith.mulf %208, %208 : vector<2x32xf32>
    %cst_78 = arith.constant 0.000000e+00 : f32
    %210 = vector.broadcast %cst_78 : f32 to vector<2x32xf32>
    %211 = arith.subf %210, %209 : vector<2x32xf32>
    %212 = math.exp %211 : vector<2x32xf32>
    %cst_79 = arith.constant -2.500000e+00 : f32
    %213 = vector.broadcast %cst_79 : f32 to vector<2x32xf32>
    %214 = arith.subf %206, %213 : vector<2x32xf32>
    %215 = arith.mulf %214, %214 : vector<2x32xf32>
    %cst_80 = arith.constant 0.000000e+00 : f32
    %216 = vector.broadcast %cst_80 : f32 to vector<2x32xf32>
    %217 = arith.subf %216, %215 : vector<2x32xf32>
    %218 = math.exp %217 : vector<2x32xf32>
    %cst_81 = arith.constant -1.500000e+00 : f32
    %219 = vector.broadcast %cst_81 : f32 to vector<2x32xf32>
    %220 = arith.subf %206, %219 : vector<2x32xf32>
    %221 = arith.mulf %220, %220 : vector<2x32xf32>
    %cst_82 = arith.constant 0.000000e+00 : f32
    %222 = vector.broadcast %cst_82 : f32 to vector<2x32xf32>
    %223 = arith.subf %222, %221 : vector<2x32xf32>
    %224 = math.exp %223 : vector<2x32xf32>
    %cst_83 = arith.constant -5.000000e-01 : f32
    %225 = vector.broadcast %cst_83 : f32 to vector<2x32xf32>
    %226 = arith.subf %206, %225 : vector<2x32xf32>
    %227 = arith.mulf %226, %226 : vector<2x32xf32>
    %cst_84 = arith.constant 0.000000e+00 : f32
    %228 = vector.broadcast %cst_84 : f32 to vector<2x32xf32>
    %229 = arith.subf %228, %227 : vector<2x32xf32>
    %230 = math.exp %229 : vector<2x32xf32>
    %cst_85 = arith.constant 5.000000e-01 : f32
    %231 = vector.broadcast %cst_85 : f32 to vector<2x32xf32>
    %232 = arith.subf %206, %231 : vector<2x32xf32>
    %233 = arith.mulf %232, %232 : vector<2x32xf32>
    %cst_86 = arith.constant 0.000000e+00 : f32
    %234 = vector.broadcast %cst_86 : f32 to vector<2x32xf32>
    %235 = arith.subf %234, %233 : vector<2x32xf32>
    %236 = math.exp %235 : vector<2x32xf32>
    %cst_87 = arith.constant 1.500000e+00 : f32
    %237 = vector.broadcast %cst_87 : f32 to vector<2x32xf32>
    %238 = arith.subf %206, %237 : vector<2x32xf32>
    %239 = arith.mulf %238, %238 : vector<2x32xf32>
    %cst_88 = arith.constant 0.000000e+00 : f32
    %240 = vector.broadcast %cst_88 : f32 to vector<2x32xf32>
    %241 = arith.subf %240, %239 : vector<2x32xf32>
    %242 = math.exp %241 : vector<2x32xf32>
    %cst_89 = arith.constant 2.500000e+00 : f32
    %243 = vector.broadcast %cst_89 : f32 to vector<2x32xf32>
    %244 = arith.subf %206, %243 : vector<2x32xf32>
    %245 = arith.mulf %244, %244 : vector<2x32xf32>
    %cst_90 = arith.constant 0.000000e+00 : f32
    %246 = vector.broadcast %cst_90 : f32 to vector<2x32xf32>
    %247 = arith.subf %246, %245 : vector<2x32xf32>
    %248 = math.exp %247 : vector<2x32xf32>
    %cst_91 = arith.constant 3.500000e+00 : f32
    %249 = vector.broadcast %cst_91 : f32 to vector<2x32xf32>
    %250 = arith.subf %206, %249 : vector<2x32xf32>
    %251 = arith.mulf %250, %250 : vector<2x32xf32>
    %cst_92 = arith.constant 0.000000e+00 : f32
    %252 = vector.broadcast %cst_92 : f32 to vector<2x32xf32>
    %253 = arith.subf %252, %251 : vector<2x32xf32>
    %254 = math.exp %253 : vector<2x32xf32>
    %255 = arith.negf %0 : vector<2x32xf32>
    %256 = math.exp %255 : vector<2x32xf32>
    %cst_93 = arith.constant 1.000000e+00 : f32
    %257 = vector.broadcast %cst_93 : f32 to vector<2x32xf32>
    %258 = arith.addf %257, %256 : vector<2x32xf32>
    %259 = arith.divf %257, %258 : vector<2x32xf32>
    %260 = arith.mulf %0, %259 : vector<2x32xf32>
    %261 = tpu.concatenate %212, %218, %224, %230, %236, %242, %248, %254, %260 in 1 : vector<2x32xf32>, vector<2x32xf32>, vector<2x32xf32>, vector<2x32xf32>, vector<2x32xf32>, vector<2x32xf32>, vector<2x32xf32>, vector<2x32xf32>, vector<2x32xf32> -> vector<2x288xf32>
    %262 = arith.truncf %261 : vector<2x288xf32> to vector<2x288xbf16>
    %c0_94 = arith.constant 0 : index
    %c0_95 = arith.constant 0 : index
    %263 = vector.load %arg12[%c0_94, %c0_95] : memref<288x16xbf16, #tpu.memory_space<vmem>>, vector<288x16xbf16>
    %cst_96 = arith.constant dense<0.000000e+00> : vector<2x16xf32>
    %264 = tpu.matmul %262, %263, %cst_96 {dimension_numbers = #tpu.dot_dimension_numbers<[1], [0], [0], [1], [0, 0, 1, 1], [], []>} : vector<2x288xbf16>, vector<288x16xbf16>, vector<2x16xf32> -> vector<2x16xf32>
    %c0_97 = arith.constant 0 : index
    %c0_98 = arith.constant 0 : index
    %265 = vector.load %arg13[%c0_97, %c0_98] : memref<1x16xf32, #tpu.memory_space<vmem>>, vector<1x16xf32>
    %266 = vector.broadcast %265 : vector<1x16xf32> to vector<2x16xf32>
    %267 = arith.addf %264, %266 : vector<2x16xf32>
    %c0_99 = arith.constant 0 : index
    %c0_100 = arith.constant 0 : index
    %268 = vector.load %arg14[%c0_99, %c0_100] : memref<1x16xf32, #tpu.memory_space<vmem>>, vector<1x16xf32>
    %c0_101 = arith.constant 0 : index
    %c0_102 = arith.constant 0 : index
    %269 = vector.load %arg15[%c0_101, %c0_102] : memref<1x16xf32, #tpu.memory_space<vmem>>, vector<1x16xf32>
    %cst_103 = arith.constant dense<0.000000e+00> : vector<2xf32>
    %270 = vector.multi_reduction <add>, %267, %cst_103 [1] : vector<2x16xf32> to vector<2xf32>
    %271 = vector.shape_cast %270 : vector<2xf32> to vector<2x1xf32>
    %cst_104 = arith.constant 1.600000e+01 : f32
    %272 = vector.broadcast %cst_104 : f32 to vector<2x1xf32>
    %273 = arith.divf %271, %272 : vector<2x1xf32>
    %274 = arith.mulf %267, %267 : vector<2x16xf32>
    %cst_105 = arith.constant dense<0.000000e+00> : vector<2xf32>
    %275 = vector.multi_reduction <add>, %274, %cst_105 [1] : vector<2x16xf32> to vector<2xf32>
    %276 = vector.shape_cast %275 : vector<2xf32> to vector<2x1xf32>
    %cst_106 = arith.constant 1.600000e+01 : f32
    %277 = vector.broadcast %cst_106 : f32 to vector<2x1xf32>
    %278 = arith.divf %276, %277 : vector<2x1xf32>
    %279 = arith.mulf %273, %273 : vector<2x1xf32>
    %280 = arith.subf %278, %279 : vector<2x1xf32>
    %cst_107 = arith.constant 0.000000e+00 : f32
    %281 = vector.broadcast %cst_107 : f32 to vector<2x1xf32>
    %282 = arith.maximumf %280, %281 : vector<2x1xf32>
    %283 = vector.broadcast %273 : vector<2x1xf32> to vector<2x16xf32>
    %284 = arith.subf %267, %283 : vector<2x16xf32>
    %cst_108 = arith.constant 9.99999974E-6 : f32
    %285 = vector.broadcast %cst_108 : f32 to vector<2x1xf32>
    %286 = arith.addf %282, %285 : vector<2x1xf32>
    %287 = math.rsqrt %286 : vector<2x1xf32>
    %288 = vector.broadcast %287 : vector<2x1xf32> to vector<2x16xf32>
    %289 = arith.mulf %284, %288 : vector<2x16xf32>
    %290 = vector.broadcast %268 : vector<1x16xf32> to vector<2x16xf32>
    %291 = arith.mulf %289, %290 : vector<2x16xf32>
    %292 = vector.broadcast %269 : vector<1x16xf32> to vector<2x16xf32>
    %293 = arith.addf %291, %292 : vector<2x16xf32>
    %cst_109 = arith.constant 1.750000e+00 : f32
    %294 = vector.broadcast %cst_109 : f32 to vector<2x16xf32>
    %295 = arith.mulf %293, %294 : vector<2x16xf32>
    %cst_110 = arith.constant -3.500000e+00 : f32
    %296 = vector.broadcast %cst_110 : f32 to vector<2x16xf32>
    %297 = arith.subf %295, %296 : vector<2x16xf32>
    %298 = arith.mulf %297, %297 : vector<2x16xf32>
    %cst_111 = arith.constant 0.000000e+00 : f32
    %299 = vector.broadcast %cst_111 : f32 to vector<2x16xf32>
    %300 = arith.subf %299, %298 : vector<2x16xf32>
    %301 = math.exp %300 : vector<2x16xf32>
    %cst_112 = arith.constant -2.500000e+00 : f32
    %302 = vector.broadcast %cst_112 : f32 to vector<2x16xf32>
    %303 = arith.subf %295, %302 : vector<2x16xf32>
    %304 = arith.mulf %303, %303 : vector<2x16xf32>
    %cst_113 = arith.constant 0.000000e+00 : f32
    %305 = vector.broadcast %cst_113 : f32 to vector<2x16xf32>
    %306 = arith.subf %305, %304 : vector<2x16xf32>
    %307 = math.exp %306 : vector<2x16xf32>
    %cst_114 = arith.constant -1.500000e+00 : f32
    %308 = vector.broadcast %cst_114 : f32 to vector<2x16xf32>
    %309 = arith.subf %295, %308 : vector<2x16xf32>
    %310 = arith.mulf %309, %309 : vector<2x16xf32>
    %cst_115 = arith.constant 0.000000e+00 : f32
    %311 = vector.broadcast %cst_115 : f32 to vector<2x16xf32>
    %312 = arith.subf %311, %310 : vector<2x16xf32>
    %313 = math.exp %312 : vector<2x16xf32>
    %cst_116 = arith.constant -5.000000e-01 : f32
    %314 = vector.broadcast %cst_116 : f32 to vector<2x16xf32>
    %315 = arith.subf %295, %314 : vector<2x16xf32>
    %316 = arith.mulf %315, %315 : vector<2x16xf32>
    %cst_117 = arith.constant 0.000000e+00 : f32
    %317 = vector.broadcast %cst_117 : f32 to vector<2x16xf32>
    %318 = arith.subf %317, %316 : vector<2x16xf32>
    %319 = math.exp %318 : vector<2x16xf32>
    %cst_118 = arith.constant 5.000000e-01 : f32
    %320 = vector.broadcast %cst_118 : f32 to vector<2x16xf32>
    %321 = arith.subf %295, %320 : vector<2x16xf32>
    %322 = arith.mulf %321, %321 : vector<2x16xf32>
    %cst_119 = arith.constant 0.000000e+00 : f32
    %323 = vector.broadcast %cst_119 : f32 to vector<2x16xf32>
    %324 = arith.subf %323, %322 : vector<2x16xf32>
    %325 = math.exp %324 : vector<2x16xf32>
    %cst_120 = arith.constant 1.500000e+00 : f32
    %326 = vector.broadcast %cst_120 : f32 to vector<2x16xf32>
    %327 = arith.subf %295, %326 : vector<2x16xf32>
    %328 = arith.mulf %327, %327 : vector<2x16xf32>
    %cst_121 = arith.constant 0.000000e+00 : f32
    %329 = vector.broadcast %cst_121 : f32 to vector<2x16xf32>
    %330 = arith.subf %329, %328 : vector<2x16xf32>
    %331 = math.exp %330 : vector<2x16xf32>
    %cst_122 = arith.constant 2.500000e+00 : f32
    %332 = vector.broadcast %cst_122 : f32 to vector<2x16xf32>
    %333 = arith.subf %295, %332 : vector<2x16xf32>
    %334 = arith.mulf %333, %333 : vector<2x16xf32>
    %cst_123 = arith.constant 0.000000e+00 : f32
    %335 = vector.broadcast %cst_123 : f32 to vector<2x16xf32>
    %336 = arith.subf %335, %334 : vector<2x16xf32>
    %337 = math.exp %336 : vector<2x16xf32>
    %cst_124 = arith.constant 3.500000e+00 : f32
    %338 = vector.broadcast %cst_124 : f32 to vector<2x16xf32>
    %339 = arith.subf %295, %338 : vector<2x16xf32>
    %340 = arith.mulf %339, %339 : vector<2x16xf32>
    %cst_125 = arith.constant 0.000000e+00 : f32
    %341 = vector.broadcast %cst_125 : f32 to vector<2x16xf32>
    %342 = arith.subf %341, %340 : vector<2x16xf32>
    %343 = math.exp %342 : vector<2x16xf32>
    %344 = arith.negf %267 : vector<2x16xf32>
    %345 = math.exp %344 : vector<2x16xf32>
    %cst_126 = arith.constant 1.000000e+00 : f32
    %346 = vector.broadcast %cst_126 : f32 to vector<2x16xf32>
    %347 = arith.addf %346, %345 : vector<2x16xf32>
    %348 = arith.divf %346, %347 : vector<2x16xf32>
    %349 = arith.mulf %267, %348 : vector<2x16xf32>
    %350 = tpu.concatenate %301, %307, %313, %319, %325, %331, %337, %343, %349 in 1 : vector<2x16xf32>, vector<2x16xf32>, vector<2x16xf32>, vector<2x16xf32>, vector<2x16xf32>, vector<2x16xf32>, vector<2x16xf32>, vector<2x16xf32>, vector<2x16xf32> -> vector<2x144xf32>
    %351 = arith.truncf %350 : vector<2x144xf32> to vector<2x144xbf16>
    %c0_127 = arith.constant 0 : index
    %c0_128 = arith.constant 0 : index
    %352 = vector.load %arg16[%c0_127, %c0_128] : memref<144x8xbf16, #tpu.memory_space<vmem>>, vector<144x8xbf16>
    %cst_129 = arith.constant dense<0.000000e+00> : vector<2x8xf32>
    %353 = tpu.matmul %351, %352, %cst_129 {dimension_numbers = #tpu.dot_dimension_numbers<[1], [0], [0], [1], [0, 0, 1, 1], [], []>} : vector<2x144xbf16>, vector<144x8xbf16>, vector<2x8xf32> -> vector<2x8xf32>
    %c0_130 = arith.constant 0 : index
    %c0_131 = arith.constant 0 : index
    %354 = vector.load %arg17[%c0_130, %c0_131] : memref<1x8xf32, #tpu.memory_space<vmem>>, vector<1x8xf32>
    %355 = vector.broadcast %354 : vector<1x8xf32> to vector<2x8xf32>
    %356 = arith.addf %353, %355 : vector<2x8xf32>
    %357 = arith.addf %178, %356 : vector<2x8xf32>
    %c0_132 = arith.constant 0 : index
    %c0_133 = arith.constant 0 : index
    %358 = vector.load %arg18[%c0_132, %c0_133] : memref<1x32xf32, #tpu.memory_space<vmem>>, vector<1x32xf32>
    %c0_134 = arith.constant 0 : index
    %c0_135 = arith.constant 0 : index
    %359 = vector.load %arg19[%c0_134, %c0_135] : memref<1x32xf32, #tpu.memory_space<vmem>>, vector<1x32xf32>
    %cst_136 = arith.constant dense<0.000000e+00> : vector<2xf32>
    %360 = vector.multi_reduction <add>, %0, %cst_136 [1] : vector<2x32xf32> to vector<2xf32>
    %361 = vector.shape_cast %360 : vector<2xf32> to vector<2x1xf32>
    %cst_137 = arith.constant 3.200000e+01 : f32
    %362 = vector.broadcast %cst_137 : f32 to vector<2x1xf32>
    %363 = arith.divf %361, %362 : vector<2x1xf32>
    %364 = arith.mulf %0, %0 : vector<2x32xf32>
    %cst_138 = arith.constant dense<0.000000e+00> : vector<2xf32>
    %365 = vector.multi_reduction <add>, %364, %cst_138 [1] : vector<2x32xf32> to vector<2xf32>
    %366 = vector.shape_cast %365 : vector<2xf32> to vector<2x1xf32>
    %cst_139 = arith.constant 3.200000e+01 : f32
    %367 = vector.broadcast %cst_139 : f32 to vector<2x1xf32>
    %368 = arith.divf %366, %367 : vector<2x1xf32>
    %369 = arith.mulf %363, %363 : vector<2x1xf32>
    %370 = arith.subf %368, %369 : vector<2x1xf32>
    %cst_140 = arith.constant 0.000000e+00 : f32
    %371 = vector.broadcast %cst_140 : f32 to vector<2x1xf32>
    %372 = arith.maximumf %370, %371 : vector<2x1xf32>
    %373 = vector.broadcast %363 : vector<2x1xf32> to vector<2x32xf32>
    %374 = arith.subf %0, %373 : vector<2x32xf32>
    %cst_141 = arith.constant 9.99999974E-6 : f32
    %375 = vector.broadcast %cst_141 : f32 to vector<2x1xf32>
    %376 = arith.addf %372, %375 : vector<2x1xf32>
    %377 = math.rsqrt %376 : vector<2x1xf32>
    %378 = vector.broadcast %377 : vector<2x1xf32> to vector<2x32xf32>
    %379 = arith.mulf %374, %378 : vector<2x32xf32>
    %380 = vector.broadcast %358 : vector<1x32xf32> to vector<2x32xf32>
    %381 = arith.mulf %379, %380 : vector<2x32xf32>
    %382 = vector.broadcast %359 : vector<1x32xf32> to vector<2x32xf32>
    %383 = arith.addf %381, %382 : vector<2x32xf32>
    %cst_142 = arith.constant -1.200000e+00 : f32
    %384 = vector.broadcast %cst_142 : f32 to vector<2x32xf32>
    %385 = arith.subf %383, %384 : vector<2x32xf32>
    %cst_143 = arith.constant 5.000000e-01 : f32
    %386 = vector.broadcast %cst_143 : f32 to vector<2x32xf32>
    %387 = arith.mulf %385, %386 : vector<2x32xf32>
    %388 = math.tanh %387 : vector<2x32xf32>
    %389 = arith.mulf %388, %388 : vector<2x32xf32>
    %cst_144 = arith.constant 1.000000e+00 : f32
    %390 = vector.broadcast %cst_144 : f32 to vector<2x32xf32>
    %391 = arith.subf %390, %389 : vector<2x32xf32>
    %cst_145 = arith.constant -1.000000e+00 : f32
    %392 = vector.broadcast %cst_145 : f32 to vector<2x32xf32>
    %393 = arith.subf %383, %392 : vector<2x32xf32>
    %cst_146 = arith.constant 5.000000e-01 : f32
    %394 = vector.broadcast %cst_146 : f32 to vector<2x32xf32>
    %395 = arith.mulf %393, %394 : vector<2x32xf32>
    %396 = math.tanh %395 : vector<2x32xf32>
    %397 = arith.mulf %396, %396 : vector<2x32xf32>
    %cst_147 = arith.constant 1.000000e+00 : f32
    %398 = vector.broadcast %cst_147 : f32 to vector<2x32xf32>
    %399 = arith.subf %398, %397 : vector<2x32xf32>
    %cst_148 = arith.constant -8.000000e-01 : f32
    %400 = vector.broadcast %cst_148 : f32 to vector<2x32xf32>
    %401 = arith.subf %383, %400 : vector<2x32xf32>
    %cst_149 = arith.constant 5.000000e-01 : f32
    %402 = vector.broadcast %cst_149 : f32 to vector<2x32xf32>
    %403 = arith.mulf %401, %402 : vector<2x32xf32>
    %404 = math.tanh %403 : vector<2x32xf32>
    %405 = arith.mulf %404, %404 : vector<2x32xf32>
    %cst_150 = arith.constant 1.000000e+00 : f32
    %406 = vector.broadcast %cst_150 : f32 to vector<2x32xf32>
    %407 = arith.subf %406, %405 : vector<2x32xf32>
    %cst_151 = arith.constant -6.000000e-01 : f32
    %408 = vector.broadcast %cst_151 : f32 to vector<2x32xf32>
    %409 = arith.subf %383, %408 : vector<2x32xf32>
    %cst_152 = arith.constant 5.000000e-01 : f32
    %410 = vector.broadcast %cst_152 : f32 to vector<2x32xf32>
    %411 = arith.mulf %409, %410 : vector<2x32xf32>
    %412 = math.tanh %411 : vector<2x32xf32>
    %413 = arith.mulf %412, %412 : vector<2x32xf32>
    %cst_153 = arith.constant 1.000000e+00 : f32
    %414 = vector.broadcast %cst_153 : f32 to vector<2x32xf32>
    %415 = arith.subf %414, %413 : vector<2x32xf32>
    %cst_154 = arith.constant -4.000000e-01 : f32
    %416 = vector.broadcast %cst_154 : f32 to vector<2x32xf32>
    %417 = arith.subf %383, %416 : vector<2x32xf32>
    %cst_155 = arith.constant 5.000000e-01 : f32
    %418 = vector.broadcast %cst_155 : f32 to vector<2x32xf32>
    %419 = arith.mulf %417, %418 : vector<2x32xf32>
    %420 = math.tanh %419 : vector<2x32xf32>
    %421 = arith.mulf %420, %420 : vector<2x32xf32>
    %cst_156 = arith.constant 1.000000e+00 : f32
    %422 = vector.broadcast %cst_156 : f32 to vector<2x32xf32>
    %423 = arith.subf %422, %421 : vector<2x32xf32>
    %cst_157 = arith.constant -2.000000e-01 : f32
    %424 = vector.broadcast %cst_157 : f32 to vector<2x32xf32>
    %425 = arith.subf %383, %424 : vector<2x32xf32>
    %cst_158 = arith.constant 5.000000e-01 : f32
    %426 = vector.broadcast %cst_158 : f32 to vector<2x32xf32>
    %427 = arith.mulf %425, %426 : vector<2x32xf32>
    %428 = math.tanh %427 : vector<2x32xf32>
    %429 = arith.mulf %428, %428 : vector<2x32xf32>
    %cst_159 = arith.constant 1.000000e+00 : f32
    %430 = vector.broadcast %cst_159 : f32 to vector<2x32xf32>
    %431 = arith.subf %430, %429 : vector<2x32xf32>
    %cst_160 = arith.constant 0.000000e+00 : f32
    %432 = vector.broadcast %cst_160 : f32 to vector<2x32xf32>
    %433 = arith.subf %383, %432 : vector<2x32xf32>
    %cst_161 = arith.constant 5.000000e-01 : f32
    %434 = vector.broadcast %cst_161 : f32 to vector<2x32xf32>
    %435 = arith.mulf %433, %434 : vector<2x32xf32>
    %436 = math.tanh %435 : vector<2x32xf32>
    %437 = arith.mulf %436, %436 : vector<2x32xf32>
    %cst_162 = arith.constant 1.000000e+00 : f32
    %438 = vector.broadcast %cst_162 : f32 to vector<2x32xf32>
    %439 = arith.subf %438, %437 : vector<2x32xf32>
    %cst_163 = arith.constant 2.000000e-01 : f32
    %440 = vector.broadcast %cst_163 : f32 to vector<2x32xf32>
    %441 = arith.subf %383, %440 : vector<2x32xf32>
    %cst_164 = arith.constant 5.000000e-01 : f32
    %442 = vector.broadcast %cst_164 : f32 to vector<2x32xf32>
    %443 = arith.mulf %441, %442 : vector<2x32xf32>
    %444 = math.tanh %443 : vector<2x32xf32>
    %445 = arith.mulf %444, %444 : vector<2x32xf32>
    %cst_165 = arith.constant 1.000000e+00 : f32
    %446 = vector.broadcast %cst_165 : f32 to vector<2x32xf32>
    %447 = arith.subf %446, %445 : vector<2x32xf32>
    %448 = tpu.concatenate %391, %399, %407, %415, %423, %431, %439, %447 in 1 : vector<2x32xf32>, vector<2x32xf32>, vector<2x32xf32>, vector<2x32xf32>, vector<2x32xf32>, vector<2x32xf32>, vector<2x32xf32>, vector<2x32xf32> -> vector<2x256xf32>
    %449 = arith.truncf %448 : vector<2x256xf32> to vector<2x256xbf16>
    %c0_166 = arith.constant 0 : index
    %c0_167 = arith.constant 0 : index
    %450 = vector.load %arg20[%c0_166, %c0_167] : memref<256x16xbf16, #tpu.memory_space<vmem>>, vector<256x16xbf16>
    %cst_168 = arith.constant dense<0.000000e+00> : vector<2x16xf32>
    %451 = tpu.matmul %449, %450, %cst_168 {dimension_numbers = #tpu.dot_dimension_numbers<[1], [0], [0], [1], [0, 0, 1, 1], [], []>} : vector<2x256xbf16>, vector<256x16xbf16>, vector<2x16xf32> -> vector<2x16xf32>
    %c0_169 = arith.constant 0 : index
    %c0_170 = arith.constant 0 : index
    %452 = vector.load %arg21[%c0_169, %c0_170] : memref<1x16xf32, #tpu.memory_space<vmem>>, vector<1x16xf32>
    %c0_171 = arith.constant 0 : index
    %c0_172 = arith.constant 0 : index
    %453 = vector.load %arg22[%c0_171, %c0_172] : memref<1x16xf32, #tpu.memory_space<vmem>>, vector<1x16xf32>
    %cst_173 = arith.constant dense<0.000000e+00> : vector<2xf32>
    %454 = vector.multi_reduction <add>, %451, %cst_173 [1] : vector<2x16xf32> to vector<2xf32>
    %455 = vector.shape_cast %454 : vector<2xf32> to vector<2x1xf32>
    %cst_174 = arith.constant 1.600000e+01 : f32
    %456 = vector.broadcast %cst_174 : f32 to vector<2x1xf32>
    %457 = arith.divf %455, %456 : vector<2x1xf32>
    %458 = arith.mulf %451, %451 : vector<2x16xf32>
    %cst_175 = arith.constant dense<0.000000e+00> : vector<2xf32>
    %459 = vector.multi_reduction <add>, %458, %cst_175 [1] : vector<2x16xf32> to vector<2xf32>
    %460 = vector.shape_cast %459 : vector<2xf32> to vector<2x1xf32>
    %cst_176 = arith.constant 1.600000e+01 : f32
    %461 = vector.broadcast %cst_176 : f32 to vector<2x1xf32>
    %462 = arith.divf %460, %461 : vector<2x1xf32>
    %463 = arith.mulf %457, %457 : vector<2x1xf32>
    %464 = arith.subf %462, %463 : vector<2x1xf32>
    %cst_177 = arith.constant 0.000000e+00 : f32
    %465 = vector.broadcast %cst_177 : f32 to vector<2x1xf32>
    %466 = arith.maximumf %464, %465 : vector<2x1xf32>
    %467 = vector.broadcast %457 : vector<2x1xf32> to vector<2x16xf32>
    %468 = arith.subf %451, %467 : vector<2x16xf32>
    %cst_178 = arith.constant 9.99999974E-6 : f32
    %469 = vector.broadcast %cst_178 : f32 to vector<2x1xf32>
    %470 = arith.addf %466, %469 : vector<2x1xf32>
    %471 = math.rsqrt %470 : vector<2x1xf32>
    %472 = vector.broadcast %471 : vector<2x1xf32> to vector<2x16xf32>
    %473 = arith.mulf %468, %472 : vector<2x16xf32>
    %474 = vector.broadcast %452 : vector<1x16xf32> to vector<2x16xf32>
    %475 = arith.mulf %473, %474 : vector<2x16xf32>
    %476 = vector.broadcast %453 : vector<1x16xf32> to vector<2x16xf32>
    %477 = arith.addf %475, %476 : vector<2x16xf32>
    %cst_179 = arith.constant -1.200000e+00 : f32
    %478 = vector.broadcast %cst_179 : f32 to vector<2x16xf32>
    %479 = arith.subf %477, %478 : vector<2x16xf32>
    %cst_180 = arith.constant 5.000000e-01 : f32
    %480 = vector.broadcast %cst_180 : f32 to vector<2x16xf32>
    %481 = arith.mulf %479, %480 : vector<2x16xf32>
    %482 = math.tanh %481 : vector<2x16xf32>
    %483 = arith.mulf %482, %482 : vector<2x16xf32>
    %cst_181 = arith.constant 1.000000e+00 : f32
    %484 = vector.broadcast %cst_181 : f32 to vector<2x16xf32>
    %485 = arith.subf %484, %483 : vector<2x16xf32>
    %cst_182 = arith.constant -1.000000e+00 : f32
    %486 = vector.broadcast %cst_182 : f32 to vector<2x16xf32>
    %487 = arith.subf %477, %486 : vector<2x16xf32>
    %cst_183 = arith.constant 5.000000e-01 : f32
    %488 = vector.broadcast %cst_183 : f32 to vector<2x16xf32>
    %489 = arith.mulf %487, %488 : vector<2x16xf32>
    %490 = math.tanh %489 : vector<2x16xf32>
    %491 = arith.mulf %490, %490 : vector<2x16xf32>
    %cst_184 = arith.constant 1.000000e+00 : f32
    %492 = vector.broadcast %cst_184 : f32 to vector<2x16xf32>
    %493 = arith.subf %492, %491 : vector<2x16xf32>
    %cst_185 = arith.constant -8.000000e-01 : f32
    %494 = vector.broadcast %cst_185 : f32 to vector<2x16xf32>
    %495 = arith.subf %477, %494 : vector<2x16xf32>
    %cst_186 = arith.constant 5.000000e-01 : f32
    %496 = vector.broadcast %cst_186 : f32 to vector<2x16xf32>
    %497 = arith.mulf %495, %496 : vector<2x16xf32>
    %498 = math.tanh %497 : vector<2x16xf32>
    %499 = arith.mulf %498, %498 : vector<2x16xf32>
    %cst_187 = arith.constant 1.000000e+00 : f32
    %500 = vector.broadcast %cst_187 : f32 to vector<2x16xf32>
    %501 = arith.subf %500, %499 : vector<2x16xf32>
    %cst_188 = arith.constant -6.000000e-01 : f32
    %502 = vector.broadcast %cst_188 : f32 to vector<2x16xf32>
    %503 = arith.subf %477, %502 : vector<2x16xf32>
    %cst_189 = arith.constant 5.000000e-01 : f32
    %504 = vector.broadcast %cst_189 : f32 to vector<2x16xf32>
    %505 = arith.mulf %503, %504 : vector<2x16xf32>
    %506 = math.tanh %505 : vector<2x16xf32>
    %507 = arith.mulf %506, %506 : vector<2x16xf32>
    %cst_190 = arith.constant 1.000000e+00 : f32
    %508 = vector.broadcast %cst_190 : f32 to vector<2x16xf32>
    %509 = arith.subf %508, %507 : vector<2x16xf32>
    %cst_191 = arith.constant -4.000000e-01 : f32
    %510 = vector.broadcast %cst_191 : f32 to vector<2x16xf32>
    %511 = arith.subf %477, %510 : vector<2x16xf32>
    %cst_192 = arith.constant 5.000000e-01 : f32
    %512 = vector.broadcast %cst_192 : f32 to vector<2x16xf32>
    %513 = arith.mulf %511, %512 : vector<2x16xf32>
    %514 = math.tanh %513 : vector<2x16xf32>
    %515 = arith.mulf %514, %514 : vector<2x16xf32>
    %cst_193 = arith.constant 1.000000e+00 : f32
    %516 = vector.broadcast %cst_193 : f32 to vector<2x16xf32>
    %517 = arith.subf %516, %515 : vector<2x16xf32>
    %cst_194 = arith.constant -2.000000e-01 : f32
    %518 = vector.broadcast %cst_194 : f32 to vector<2x16xf32>
    %519 = arith.subf %477, %518 : vector<2x16xf32>
    %cst_195 = arith.constant 5.000000e-01 : f32
    %520 = vector.broadcast %cst_195 : f32 to vector<2x16xf32>
    %521 = arith.mulf %519, %520 : vector<2x16xf32>
    %522 = math.tanh %521 : vector<2x16xf32>
    %523 = arith.mulf %522, %522 : vector<2x16xf32>
    %cst_196 = arith.constant 1.000000e+00 : f32
    %524 = vector.broadcast %cst_196 : f32 to vector<2x16xf32>
    %525 = arith.subf %524, %523 : vector<2x16xf32>
    %cst_197 = arith.constant 0.000000e+00 : f32
    %526 = vector.broadcast %cst_197 : f32 to vector<2x16xf32>
    %527 = arith.subf %477, %526 : vector<2x16xf32>
    %cst_198 = arith.constant 5.000000e-01 : f32
    %528 = vector.broadcast %cst_198 : f32 to vector<2x16xf32>
    %529 = arith.mulf %527, %528 : vector<2x16xf32>
    %530 = math.tanh %529 : vector<2x16xf32>
    %531 = arith.mulf %530, %530 : vector<2x16xf32>
    %cst_199 = arith.constant 1.000000e+00 : f32
    %532 = vector.broadcast %cst_199 : f32 to vector<2x16xf32>
    %533 = arith.subf %532, %531 : vector<2x16xf32>
    %cst_200 = arith.constant 2.000000e-01 : f32
    %534 = vector.broadcast %cst_200 : f32 to vector<2x16xf32>
    %535 = arith.subf %477, %534 : vector<2x16xf32>
    %cst_201 = arith.constant 5.000000e-01 : f32
    %536 = vector.broadcast %cst_201 : f32 to vector<2x16xf32>
    %537 = arith.mulf %535, %536 : vector<2x16xf32>
    %538 = math.tanh %537 : vector<2x16xf32>
    %539 = arith.mulf %538, %538 : vector<2x16xf32>
    %cst_202 = arith.constant 1.000000e+00 : f32
    %540 = vector.broadcast %cst_202 : f32 to vector<2x16xf32>
    %541 = arith.subf %540, %539 : vector<2x16xf32>
    %542 = tpu.concatenate %485, %493, %501, %509, %517, %525, %533, %541 in 1 : vector<2x16xf32>, vector<2x16xf32>, vector<2x16xf32>, vector<2x16xf32>, vector<2x16xf32>, vector<2x16xf32>, vector<2x16xf32>, vector<2x16xf32> -> vector<2x128xf32>
    %543 = arith.truncf %542 : vector<2x128xf32> to vector<2x128xbf16>
    %c0_203 = arith.constant 0 : index
    %c0_204 = arith.constant 0 : index
    %544 = vector.load %arg23[%c0_203, %c0_204] : memref<128x8xbf16, #tpu.memory_space<vmem>>, vector<128x8xbf16>
    %cst_205 = arith.constant dense<0.000000e+00> : vector<2x8xf32>
    %545 = tpu.matmul %543, %544, %cst_205 {dimension_numbers = #tpu.dot_dimension_numbers<[1], [0], [0], [1], [0, 0, 1, 1], [], []>} : vector<2x128xbf16>, vector<128x8xbf16>, vector<2x8xf32> -> vector<2x8xf32>
    %546 = arith.addf %357, %545 : vector<2x8xf32>
    %c0_206 = arith.constant 0 : index
    %c0_207 = arith.constant 0 : index
    %547 = vector.load %arg24[%c0_206, %c0_207] : memref<2x8xf32, #tpu.memory_space<vmem>>, vector<2x8xf32>
    tpu.vector_store %arg24[%c0_206, %c0_207], %546 {strides = array<i32>} : memref<2x8xf32, #tpu.memory_space<vmem>>, vector<2x8xf32>,
    return
  }
  func.func @transform_0(%arg0: i32) -> (i32, i32) {
    %c0_i32 = arith.constant 0 : i32
    %c0_i32_0 = arith.constant 0 : i32
    return %arg0, %c0_i32 : i32, i32
  }
  func.func @transform_1(%arg0: i32) -> (i32, i32) {
    %c0_i32 = arith.constant 0 : i32
    %c0_i32_0 = arith.constant 0 : i32
    %c0_i32_1 = arith.constant 0 : i32
    return %c0_i32, %c0_i32_0 : i32, i32
  }
  func.func @transform_2(%arg0: i32) -> (i32, i32) {
    %c0_i32 = arith.constant 0 : i32
    %c0_i32_0 = arith.constant 0 : i32
    %c0_i32_1 = arith.constant 0 : i32
    return %c0_i32, %c0_i32_0 : i32, i32
  }
  func.func @transform_3(%arg0: i32) -> (i32, i32) {
    %c0_i32 = arith.constant 0 : i32
    %c0_i32_0 = arith.constant 0 : i32
    %c0_i32_1 = arith.constant 0 : i32
    return %c0_i32, %c0_i32_0 : i32, i32
  }
  func.func @transform_4(%arg0: i32) -> (i32, i32) {
    %c0_i32 = arith.constant 0 : i32
    %c0_i32_0 = arith.constant 0 : i32
    %c0_i32_1 = arith.constant 0 : i32
    return %c0_i32, %c0_i32_0 : i32, i32
  }
  func.func @transform_5(%arg0: i32) -> (i32, i32) {
    %c0_i32 = arith.constant 0 : i32
    %c0_i32_0 = arith.constant 0 : i32
    %c0_i32_1 = arith.constant 0 : i32
    return %c0_i32, %c0_i32_0 : i32, i32
  }
  func.func @transform_6(%arg0: i32) -> (i32, i32) {
    %c0_i32 = arith.constant 0 : i32
    %c0_i32_0 = arith.constant 0 : i32
    %c0_i32_1 = arith.constant 0 : i32
    return %c0_i32, %c0_i32_0 : i32, i32
  }
  func.func @transform_7(%arg0: i32) -> (i32, i32) {
    %c0_i32 = arith.constant 0 : i32
    %c0_i32_0 = arith.constant 0 : i32
    %c0_i32_1 = arith.constant 0 : i32
    return %c0_i32, %c0_i32_0 : i32, i32
  }
  func.func @transform_8(%arg0: i32) -> (i32, i32) {
    %c0_i32 = arith.constant 0 : i32
    %c0_i32_0 = arith.constant 0 : i32
    %c0_i32_1 = arith.constant 0 : i32
    return %c0_i32, %c0_i32_0 : i32, i32
  }
  func.func @transform_9(%arg0: i32) -> (i32, i32) {
    %c0_i32 = arith.constant 0 : i32
    %c0_i32_0 = arith.constant 0 : i32
    %c0_i32_1 = arith.constant 0 : i32
    return %c0_i32, %c0_i32_0 : i32, i32
  }
  func.func @transform_10(%arg0: i32) -> (i32, i32) {
    %c0_i32 = arith.constant 0 : i32
    %c0_i32_0 = arith.constant 0 : i32
    %c0_i32_1 = arith.constant 0 : i32
    return %c0_i32, %c0_i32_0 : i32, i32
  }
  func.func @transform_11(%arg0: i32) -> (i32, i32) {
    %c0_i32 = arith.constant 0 : i32
    %c0_i32_0 = arith.constant 0 : i32
    %c0_i32_1 = arith.constant 0 : i32
    return %c0_i32, %c0_i32_0 : i32, i32
  }
  func.func @transform_12(%arg0: i32) -> (i32, i32) {
    %c0_i32 = arith.constant 0 : i32
    %c0_i32_0 = arith.constant 0 : i32
    %c0_i32_1 = arith.constant 0 : i32
    return %c0_i32, %c0_i32_0 : i32, i32
  }
  func.func @transform_13(%arg0: i32) -> (i32, i32) {
    %c0_i32 = arith.constant 0 : i32
    %c0_i32_0 = arith.constant 0 : i32
    %c0_i32_1 = arith.constant 0 : i32
    return %c0_i32, %c0_i32_0 : i32, i32
  }
  func.func @transform_14(%arg0: i32) -> (i32, i32) {
    %c0_i32 = arith.constant 0 : i32
    %c0_i32_0 = arith.constant 0 : i32
    %c0_i32_1 = arith.constant 0 : i32
    return %c0_i32, %c0_i32_0 : i32, i32
  }
  func.func @transform_15(%arg0: i32) -> (i32, i32) {
    %c0_i32 = arith.constant 0 : i32
    %c0_i32_0 = arith.constant 0 : i32
    %c0_i32_1 = arith.constant 0 : i32
    return %c0_i32, %c0_i32_0 : i32, i32
  }
  func.func @transform_16(%arg0: i32) -> (i32, i32) {
    %c0_i32 = arith.constant 0 : i32
    %c0_i32_0 = arith.constant 0 : i32
    %c0_i32_1 = arith.constant 0 : i32
    return %c0_i32, %c0_i32_0 : i32, i32
  }
  func.func @transform_17(%arg0: i32) -> (i32, i32) {
    %c0_i32 = arith.constant 0 : i32
    %c0_i32_0 = arith.constant 0 : i32
    %c0_i32_1 = arith.constant 0 : i32
    return %c0_i32, %c0_i32_0 : i32, i32
  }
  func.func @transform_18(%arg0: i32) -> (i32, i32) {
    %c0_i32 = arith.constant 0 : i32
    %c0_i32_0 = arith.constant 0 : i32
    %c0_i32_1 = arith.constant 0 : i32
    return %c0_i32, %c0_i32_0 : i32, i32
  }
  func.func @transform_19(%arg0: i32) -> (i32, i32) {
    %c0_i32 = arith.constant 0 : i32
    %c0_i32_0 = arith.constant 0 : i32
    %c0_i32_1 = arith.constant 0 : i32
    return %c0_i32, %c0_i32_0 : i32, i32
  }
  func.func @transform_20(%arg0: i32) -> (i32, i32) {
    %c0_i32 = arith.constant 0 : i32
    %c0_i32_0 = arith.constant 0 : i32
    %c0_i32_1 = arith.constant 0 : i32
    return %c0_i32, %c0_i32_0 : i32, i32
  }
  func.func @transform_21(%arg0: i32) -> (i32, i32) {
    %c0_i32 = arith.constant 0 : i32
    %c0_i32_0 = arith.constant 0 : i32
    %c0_i32_1 = arith.constant 0 : i32
    return %c0_i32, %c0_i32_0 : i32, i32
  }
  func.func @transform_22(%arg0: i32) -> (i32, i32) {
    %c0_i32 = arith.constant 0 : i32
    %c0_i32_0 = arith.constant 0 : i32
    %c0_i32_1 = arith.constant 0 : i32
    return %c0_i32, %c0_i32_0 : i32, i32
  }
  func.func @transform_23(%arg0: i32) -> (i32, i32) {
    %c0_i32 = arith.constant 0 : i32
    %c0_i32_0 = arith.constant 0 : i32
    return %arg0, %c0_i32 : i32, i32
  }
}

</mosaic_0001>

<bundles_post_ra>
// kernel: transformer_ensemble_kan_forward.1
= control target key start
LH: loop header
LB: loop body
LE: loop exit
PB: predicated region body
PF: predicated region fallthrough
CT: control target
= control target key end

     0   :  { %s2867_s0 = inlined_call_operand.vmem [shape: f32[2,32], index: 0, kind: input, shape index: {}]   ;;  %s2868_s1 = inlined_call_operand.vmem [shape: f32[1,32], index: 1, kind: input, shape index: {}]   ;;  %s2869_s2 = inlined_call_operand.vmem [shape: f32[1,32], index: 2, kind: input, shape index: {}]   ;;  %s2870_s3 = inlined_call_operand.vmem [shape: bf16[288,16], index: 3, kind: input, shape index: {}]   ;;  %s2871_s4 = inlined_call_operand.vmem [shape: f32[1,16], index: 4, kind: input, shape index: {}]   ;;  %s2872_s5 = inlined_call_operand.vmem [shape: f32[1,16], index: 5, kind: input, shape index: {}]   ;;  %s2873_s6 = inlined_call_operand.vmem [shape: f32[1,16], index: 6, kind: input, shape index: {}]   ;;  %s2874_s7 = inlined_call_operand.vmem [shape: bf16[144,8], index: 7, kind: input, shape index: {}]   ;;  %s2875_s8 = inlined_call_operand.vmem [shape: f32[1,8], index: 8, kind: input, shape index: {}]   ;;  %s2876_s9 = inlined_call_operand.vmem [shape: f32[1,32], index: 9, kind: input, shape index: {}]   ;;  %s2877_s10 = inlined_call_operand.vmem [shape: f32[1,32], index: 10, kind: input, shape index: {}]   ;;  %s2878_s11 = inlined_call_operand.vmem [shape: bf16[288,16], index: 11, kind: input, shape index: {}]   ;;  %s2879_s12 = inlined_call_operand.vmem [shape: f32[1,16], index: 12, kind: input, shape index: {}]   ;;  %s2880_s13 = inlined_call_operand.vmem [shape: f32[1,16], index: 13, kind: input, shape index: {}]   ;;  %s2881_s14 = inlined_call_operand.vmem [shape: f32[1,16], index: 14, kind: input, shape index: {}]   ;;  %s2882_s15 = inlined_call_operand.vmem [shape: bf16[144,8], index: 15, kind: input, shape index: {}]   ;;  %s2883_s16 = inlined_call_operand.vmem [shape: f32[1,8], index: 16, kind: input, shape index: {}]   ;;  %s2884_s17 = inlined_call_operand.vmem [shape: f32[1,32], index: 17, kind: input, shape index: {}]   ;;  %s2885_s18 = inlined_call_operand.vmem [shape: f32[1,32], index: 18, kind: input, shape index: {}]   ;;  %s2886_s19 = inlined_call_operand.vmem [shape: bf16[256,16], index: 19, kind: input, shape index: {}]   ;;  %s2887_s20 = inlined_call_operand.vmem [shape: f32[1,16], index: 20, kind: input, shape index: {}]   ;;  %s2888_s21 = inlined_call_operand.vmem [shape: f32[1,16], index: 21, kind: input, shape index: {}]   ;;  %s2889_s22 = inlined_call_operand.vmem [shape: bf16[128,8], index: 22, kind: input, shape index: {}]   ;;  %s2890_s23 = inlined_call_operand.hbm [shape: f32[2,8], index: 23, kind: output, shape index: {}]  }
   0x1   :  { %2893 = sst [smem:[#allocation5_spill]] %s2867_s0 }
   0x2   :  { %2894 = sst [smem:[#allocation6_spill]] %s2868_s1 }
   0x3   :  { %2895 = sst [smem:[#allocation7_spill]] %s2869_s2 }
   0x4   :  { %2896 = sst [smem:[#allocation8_spill]] %s2870_s3 }
   0x5   :  { %2897 = sst [smem:[#allocation9_spill]] %s2871_s4 }
   0x6   :  { %2898 = sst [smem:[#allocation10_spill]] %s2872_s5 }
   0x7   :  { %2899 = sst [smem:[#allocation11_spill]] %s2873_s6 }
   0x8   :  { %2900 = sst [smem:[#allocation12_spill]] %s2874_s7 }
   0x9   :  { %s2901_s24 = sld [smem:[#allocation5_spill]]  ;;  %vm79_vm0 = vcmask 254976  }
   0xf   :  { %v2387_v0 = vld [vmem:[%s2901_s24] sm:$0x3] }
  0x10   :  { %v80_v1 = vsel %vm79_vm0, %v2387_v0, 0.0  ;;  %v85_v2 = vmul.f32 %v2387_v0, %v2387_v0 }
  0x11   :  { %81 = vadd.xlane.f32.xlu0 %v80_v1 }
  0x12   :  { %v86_v3 = vsel %vm79_vm0, %v85_v2, 0.0 }
  0x15   :  { %87 = vadd.xlane.f32.xlu0 %v86_v3 }
  0x16   :  { %28 = vsyncpa [#allocation3], 0  ;;  %s2902_s1 = sld [smem:[#allocation8_spill]]  ;;  %s2253_s0 = smov 96   ;;  %vm183_vm1 = vcmask 261120   ;;  %vm185_vm2 = vcmask 523264  }
  0x17   :  { %s2903_s30 = sld [smem:[#allocation6_spill]]  ;;  %s2255_s4 = smov 32   ;;  %vm187_vm3 = vcmask 785408   ;;  %vm2257_vm4 = vmmov 0   ;;  %vm431_vm5 = vcmask 123904   ;;  %vm539_vm6 = vcmask 130048  }
  0x18   :  { %s2904_s5 = sld [smem:[#allocation7_spill]]  ;;  %s2260_s6 = smov 48   ;;  %vm542_vm7 = vcmask 392192   ;;  %vm545_vm8 = vcmask 654336   ;;  %vm548_vm9 = vcmask 916480   ;;  %vm1701_vm10 = vcmask 58368  }
  0x19   :  { %s2905_s27 = sld [smem:[#allocation9_spill]] }
  0x1a   :  { %s2906_s28 = sld [smem:[#allocation12_spill]] }
  0x1b   :  { %s2907_s25 = sld [smem:[#allocation10_spill]] }
  0x1c   :  { %v2037_v4 = vld [vmem:[%s2902_s1 + $0x78] sm:$0xff]   ;;  %v2039_v6 = vld [vmem:[%s2902_s1 + $0x70] sm:$0xff]   ;;  %v2041_v8 = vld [vmem:[%s2902_s1 + $0x68] sm:$0xff]   ;;  %s2908_s2 = sld [smem:[#allocation11_spill]] }
  0x1d   :  { %v2038_v5 = vld [vmem:[%s2902_s1 + $0x38] sm:$0xff]   ;;  %1864 = vmatprep.subr.bf16.mxu0 %v2037_v4  ;;  %v2040_v7 = vld [vmem:[%s2902_s1 + $0x30] sm:$0xff]   ;;  %v2042_v9 = vld [vmem:[%s2902_s1 + $0x28] sm:$0xff]   ;;  %v2254_v4 = vmov 0.0  }
  0x1e   :  { %1865 = vmatpush3.bf16.msra.mxu0 %v2038_v5  ;;  %v2043_v10 = vld [vmem:[%s2902_s1 + $0x60] sm:$0xff]   ;;  %v2045_v12 = vld [vmem:[%s2902_s1 + $0x58] sm:$0xff]   ;;  %v2047_v14 = vld [vmem:[%s2902_s1 + $0x50] sm:$0xff]  }
  0x1f   :  { %1866 = vmatprep.subr.bf16.mxu0 %v2039_v6  ;;  %v2044_v11 = vld [vmem:[%s2902_s1 + $0x20] sm:$0xff]   ;;  %v2046_v13 = vld [vmem:[%s2902_s1 + $0x18] sm:$0xff]   ;;  %v2048_v15 = vld [vmem:[%s2902_s1 + $0x10] sm:$0xff]  }
  0x20   :  { %v1717_v26 = vld [vmem:[%s2903_s30] ss:$0 sm:$0xff]  ;;  %v2049_v56 = vld [vmem:[%s2902_s1 + $0x48] sm:$0xff]   ;;  %s2256_s30 = smov 64  }
  0x21   :  { %v1718_v28 = vld [vmem:[%s2904_s5] ss:$0 sm:$0xff]  ;;  %v2050_v57 = vld [vmem:[%s2902_s1 + $0x8] sm:$0xff]  }
  0x22   :  { %1867 = vmatpush3.bf16.msra.mxu0 %v2040_v7  ;;  %v2051_v58 = vld [vmem:[%s2902_s1 + $0x40] sm:$0xff]   ;;  %v1727_v7 = vmul.f32 -1.442695, %v2387_v0 }
  0x23   :  { %1868 = vmatprep.subr.bf16.mxu0 %v2041_v8  ;;  %v2052_v59 = vld [vmem:[%s2902_s1] sm:$0xff]  }
  0x26   :  { %1869 = vmatpush3.bf16.msra.mxu0 %v2042_v9 }
  0x27   :  { %1870 = vmatprep.subr.bf16.mxu0 %v2043_v10 }
  0x2a   :  { %1871 = vmatpush3.bf16.msra.mxu0 %v2044_v11 }
  0x2b   :  { %1872 = vmatprep.subr.bf16.mxu0 %v2045_v12 }
  0x2e   :  { %1873 = vmatpush3.bf16.msra.mxu0 %v2046_v13 }
  0x2f   :  { %1874 = vmatprep.subr.bf16.mxu0 %v2047_v14 }
  0x32   :  { %1875 = vmatpush3.bf16.msra.mxu0 %v2048_v15 }
  0x33   :  { %1876 = vmatprep.subr.bf16.mxu0 %v2049_v56 }
  0x36   :  { %1877 = vmatpush3.bf16.msra.mxu0 %v2050_v57 }
  0x37   :  { %1878 = vmatprep.subr.bf16.mxu0 %v2051_v58 }
  0x3a   :  { %1879 = vmatpush3.bf16.msra.mxu0 %v2052_v59 }
  0x3b   :  { %1945 = vmatprep.subr.bf16.mxu0 %v2254_v4 }
  0x9a   :  { %v82_v16 = vpop.xlane.xlu0 %81 }
  0x9b   :  { %v84_v17 = vmul.f32 0.03125, %v82_v16 }
  0x9d   :  { %v90_v19 = vmul.f32 %v84_v17, %v84_v17  ;;  %v93_v24 = vsub.f32 %v2387_v0, %v84_v17 }
  0x9e   :  { %v88_v18 = vpop.xlane.xlu0 %87 }
  0x9f   :  { %v89_v20 = vmul.f32 0.03125, %v88_v18 }
  0xa1   :  { %v91_v21 = vsub.f32 %v89_v20, %v90_v19 }
  0xa3   :  { %v92_v22 = vmax.f32 %v91_v21, 0.0 }
  0xa5   :  { %v94_v23 = vadd.f32 1e-05, %v92_v22 }
  0xa7   :  { %2115 = vrsqrt.f32 %v94_v23 }
  0xb4   :  { %v2116_v25 = vpop.eup %2115 }
  0xb5   :  { %v2432_v27 = vmul.f32 %v2116_v25, %v93_v24 }
  0xb7   :  { %v103_v29 = vmul.f32 %v1717_v26, %v2432_v27 }
  0xb9   :  { %v110_v30 = vadd.f32 %v1718_v28, %v103_v29 }
  0xbb   :  { %v111_v31 = vmul.f32 1.75, %v110_v30 }
  0xbd   :  { %v1722_v32 = vadd.f32 0.5, %v111_v31  ;;  %v1726_v33 = vadd.f32 -3.5, %v111_v31  ;;  %v1720_v34 = vadd.f32 2.5, %v111_v31  ;;  %v1724_v35 = vadd.f32 -1.5, %v111_v31 }
  0xbe   :  { %v1721_v36 = vadd.f32 1.5, %v111_v31  ;;  %v1725_v37 = vadd.f32 -2.5, %v111_v31  ;;  %v1719_v8 = vadd.f32 3.5, %v111_v31  ;;  %v1723_v9 = vadd.f32 -0.5, %v111_v31 }
  0xbf   :  { %v128_v38 = vmul.f32 %v1722_v32, %v1722_v32  ;;  %v148_v39 = vmul.f32 %v1726_v33, %v1726_v33  ;;  %v118_v40 = vmul.f32 %v1720_v34, %v1720_v34  ;;  %v138_v41 = vmul.f32 %v1724_v35, %v1724_v35 }
  0xc0   :  { %v123_v42 = vmul.f32 %v1721_v36, %v1721_v36  ;;  %v143_v43 = vmul.f32 %v1725_v37, %v1725_v37  ;;  %v113_v10 = vmul.f32 %v1719_v8, %v1719_v8  ;;  %v133_v11 = vmul.f32 %v1723_v9, %v1723_v9 }
  0xc1   :  { %v129_v44 = vsub.f32 0.0, %v128_v38  ;;  %v149_v45 = vsub.f32 0.0, %v148_v39  ;;  %v119_v46 = vsub.f32 0.0, %v118_v40  ;;  %v139_v47 = vsub.f32 0.0, %v138_v41  ;;  %v2053_v39 = vld [vmem:[%s2902_s1 + $0x88] sm:$0xff]   ;;  %v2054_v41 = vld [vmem:[%s2902_s1 + $0x80] sm:$0xff]  }
  0xc2   :  { %v124_v48 = vsub.f32 0.0, %v123_v42  ;;  %v144_v49 = vsub.f32 0.0, %v143_v43  ;;  %v114_v12 = vsub.f32 0.0, %v113_v10  ;;  %v134_v13 = vsub.f32 0.0, %v133_v11  ;;  %s2262_s1 = smov 112  }
  0xc3   :  { %v130_v50 = vmul.f32 1.442695, %v129_v44  ;;  %v150_v51 = vmul.f32 1.442695, %v149_v45  ;;  %v120_v52 = vmul.f32 1.442695, %v119_v46 }
  0xc4   :  { %v140_v53 = vmul.f32 1.442695, %v139_v47  ;;  %v125_v54 = vmul.f32 1.442695, %v124_v48  ;;  %v145_v55 = vmul.f32 1.442695, %v144_v49 }
  0xc5   :  { %2117 = vpow2.f32 %v130_v50  ;;  %v115_v14 = vmul.f32 1.442695, %v114_v12  ;;  %v135_v15 = vmul.f32 1.442695, %v134_v13  ;;  %v1728_v46 = vld [vmem:[%s2905_s27] ss:$0 sm:$0xff] }
  0xc6   :  { %2119 = vpow2.f32 %v150_v51  ;;  %v1770_v12 = vld [vmem:[%s2876_s9] ss:$0 sm:$0xff] }
  0xc7   :  { %2121 = vpow2.f32 %v120_v52 }
  0xc8   :  { %2123 = vpow2.f32 %v140_v53 }
  0xc9   :  { %2125 = vpow2.f32 %v125_v54 }
  0xca   :  { %2127 = vpow2.f32 %v145_v55 }
  0xcb   :  { %2129 = vpow2.f32 %v1727_v7 }
  0xcc   :  { %2131 = vpow2.f32 %v115_v14 }
  0xcd   :  { %2133 = vpow2.f32 %v135_v15  ;;  %v682_v15 = vmul.f32 %v1770_v12, %v2432_v27 }
  0xd2   :  { %v2118_v60 = vpop.eup %2117 }
  0xd3   :  { %v2120_v61 = vpop.eup %2119 }
  0xd4   :  { %v2122_v62 = vpop.eup %2121  ;;  %v2002_v63 = vpack.i.bf16 %v2118_v60, %v2120_v61 }
  0xd5   :  { %v2124_v1 = vpop.eup %2123 }
  0xd6   :  { %v2126_v2 = vpop.eup %2125  ;;  %2003 = vrot.lane.b32.xlu0 %v2002_v63, %s2253_s0  ;;  %v1992_v3 = vpack.i.bf16 %v2122_v62, %v2124_v1  ;;  %v2055_v63 = vld [vmem:[%s2906_s28 + $0x38] sm:$0xff]  }
  0xd7   :  { %v2128_v5 = vpop.eup %2127  ;;  %v2057_v1 = vld [vmem:[%s2878_s11 + $0x78] sm:$0xff]  }
  0xd8   :  { %1993 = vrot.lane.b32.xlu1 %v1992_v3, %s2255_s4  ;;  %v1997_v6 = vpack.i.bf16 %v2126_v2, %v2128_v5  ;;  %v2130_v16 = vpop.eup %2129  ;;  %v2258_v2 = vmov 0   ;;  %v2058_v3 = vld [vmem:[%s2878_s11 + $0x38] sm:$0xff]   ;;  %v2056_v5 = vld [vmem:[%s2906_s28 + $0x30] sm:$0xff]  }
  0xd9   :  { %v155_v17 = vadd.f32 1.0, %v2130_v16  ;;  %v2132_v22 = vpop.eup %2131  ;;  %634 = vmatprep.subr.bf16.mxu1 %v2258_v2  ;;  %v1771_v16 = vld [vmem:[%s2877_s10] ss:$0 sm:$0xff] }
  0xda   :  { %v2134_v24 = vpop.eup %2133  ;;  %635 = vmatpush1.bf16.msra.mxu1 %v2055_v63 }
  0xdb   :  { %2135 = vrcp.f32 %v155_v17  ;;  %636 = vmatprep.subr.bf16.mxu1 %v2258_v2  ;;  %v689_v17 = vadd.f32 %v1771_v16, %v682_v15 }
  0xdc   :  { %1998 = vrot.lane.b32.xlu1 %v1997_v6, %s2256_s30 }
  0xde   :  { %637 = vmatpush1.bf16.msra.mxu1 %v2056_v5 }
  0xdf   :  { %638 = vmatprep.subr.bf16.mxu1 %v2258_v2 }
  0xe8   :  { %v2136_v36 = vpop.eup %2135 }
  0xe9   :  { %v158_v40 = vmul.f32 %v2136_v36, %v2387_v0 }
  0xeb   :  { %v2471_v42 = vpack.c.bf16 %v158_v40, %v158_v40 }
 0x148   :  { %v2004_v21 = vpop.permute.xlu0 %2003 }
 0x149   :  { %v2006_v28 = vunpack.i.h.bf16 %v2004_v21  ;;  %v2005_v29 = vunpack.i.l.bf16 %v2004_v21 }
 0x14a   :  { %v1994_v18 = vpop.permute.xlu1 %1993 }
 0x14b   :  { %v1996_v19 = vunpack.i.h.bf16 %v1994_v18  ;;  %v1995_v20 = vunpack.i.l.bf16 %v1994_v18  ;;  %v2503_v18 = vmul.f32 1.75, %v689_v17  ;;  %v2060_v17 = vld [vmem:[%s2878_s11 + $0x70] sm:$0xff]  }
 0x14d   :  { %v184_v30 = vsel %vm183_vm1, %v2132_v22, %v1996_v19  ;;  %v189_v31 = vsel %vm183_vm1, %v2134_v24, %v1995_v20  ;;  %v1822_v19 = vld [vmem:[%s2884_s17] ss:$0 sm:$0xff]  ;;  %v1777_v20 = vadd.f32 -1.5, %v2503_v18 }
 0x14e   :  { %v1999_v23 = vpop.permute.xlu1 %1998  ;;  %v1242_v21 = vmul.f32 %v1822_v19, %v2432_v27  ;;  %v1823_v24 = vld [vmem:[%s2885_s18] ss:$0 sm:$0xff]  ;;  %v1773_v27 = vadd.f32 2.5, %v2503_v18  ;;  %v2061_v19 = vld [vmem:[%s2878_s11 + $0x30] sm:$0xff]   ;;  %s2261_s18 = smov 80  }
 0x14f   :  { %v2001_v25 = vunpack.i.h.bf16 %v1999_v23  ;;  %v2000_v26 = vunpack.i.l.bf16 %v1999_v23 }
 0x151   :  { %v186_v32 = vsel %vm185_vm2, %v184_v30, %v2001_v25  ;;  %v190_v33 = vsel %vm185_vm2, %v189_v31, %v2000_v26  ;;  %v1748_v25 = vld [vmem:[%s2907_s25] ss:$0 sm:$0xff]  ;;  %v2519_v30 = vadd.f32 %v1823_v24, %v1242_v21  ;;  %v2063_v24 = vld [vmem:[%s2878_s11 + $0x68] sm:$0xff]  }
 0x152   :  { %v191_v34 = vsel %vm187_vm3, %v190_v33, %v2005_v29  ;;  %v188_v35 = vsel %vm187_vm3, %v186_v32, %v2006_v28  ;;  %v1749_v28 = vld [vmem:[%s2908_s2] ss:$0 sm:$0xff]  ;;  %v717_v29 = vmul.f32 %v1777_v20, %v1777_v20  ;;  %s2259_s2 = smov 16  }
 0x153   :  { %v193_v37 = vpack.c.bf16 %v191_v34, %v191_v34  ;;  %v192_v38 = vpack.c.bf16 %v188_v35, %v188_v35  ;;  %v1774_v35 = vadd.f32 1.5, %v2503_v18  ;;  %v1825_v36 = vadd.f32 1.0, %v2519_v30  ;;  %v2062_v20 = vld [vmem:[%s2906_s28 + $0x20] sm:$0xff]  }
 0x154   :  { %v718_v33 = vsub.f32 0.0, %v717_v29 }
 0x155   :  { %381 = vmatprep.mubr.bf16.mxu0 %v193_v37  ;;  %v697_v37 = vmul.f32 %v1773_v27, %v1773_v27 }
 0x156   :  { %382 = vmatmul.mubr.bf16.vlgmr.msra.gmra.mxu0 %v192_v38  ;;  %v1829_v38 = vadd.f32 0.2, %v2519_v30 }
 0x157   :  { %1946 = vmatpush3.bf16.msra.mxu0 %v2053_v39  ;;  %1949 = vmatprep.mubr.msk.bf16.mxu0 %vm2257_vm4, %v2254_v4 }
 0x158   :  { %1947 = vmatprep.subr.bf16.mxu0 %v2254_v4 }
 0x15b   :  { %1948 = vmatpush3.bf16.msra.mxu0 %v2054_v41 }
 0x15c   :  { %1889 = vmatprep.subr.bf16.mxu0 %v2057_v1 }
 0x15e   :  { %1950 = vmatmul.mubr.msk.bf16.vlgmr.msra.gmra.mxu0 %vm183_vm1, %v2471_v42 }
 0x15f   :  { %1890 = vmatpush3.bf16.msra.mxu0 %v2058_v3 }
 0x160   :  { %1891 = vmatprep.subr.bf16.mxu0 %v2060_v17 }
 0x163   :  { %1892 = vmatpush3.bf16.msra.mxu0 %v2061_v19  ;;  %v2078_v19 = vld [vmem:[%s2878_s11 + $0x40] sm:$0xff]  }
 0x164   :  { %1893 = vmatprep.subr.bf16.mxu0 %v2063_v24 }
 0x216   :  { %v1880_v43 = vpop.f32.mrf.mxu0 }
 0x218   :  { %v1881_v0 = vpop.f32.mrf.mxu0 }
 0x219   :  { %v1882_v44 = vadd.f32 %v1881_v0, %v1880_v43  ;;  %v719_v0 = vmul.f32 1.442695, %v718_v33 }
 0x21a   :  { %v1883_v45 = vpop.f32.mrf.mxu0 }
 0x21b   :  { %v384_v48 = vadd.f32 %v1882_v44, %v1728_v46  ;;  %v1778_v44 = vadd.f32 -2.5, %v2503_v18  ;;  %v1827_v45 = vadd.f32 0.6, %v2519_v30 }
 0x21c   :  { %v1884_v47 = vpop.f32.mrf.mxu0 }
 0x21e   :  { %v423_v49 = vpop.f32.mrf.mxu0 }
 0x21f   :  { %v424_v50 = vadd.f32 %v423_v49, %v384_v48  ;;  %v702_v48 = vmul.f32 %v1774_v35, %v1774_v35  ;;  %v1256_v49 = vmul.f32 0.5, %v1825_v36  ;;  %v1775_v36 = vadd.f32 0.5, %v2503_v18 }
 0x220   :  { %v1951_v51 = vpop.f32.mrf.mxu0 }
 0x221   :  { %v1758_v52 = vmul.f32 -1.442695, %v424_v50  ;;  %v432_v53 = vsel %vm431_vm5, %v424_v50, 0.0  ;;  %v437_v54 = vmul.f32 %v424_v50, %v424_v50  ;;  %v1276_v51 = vmul.f32 0.5, %v1829_v38 }
 0x222   :  { %v426_v55 = vpop.f32.mrf.mxu0  ;;  %433 = vadd.xlane.f32.xlu1 %v432_v53 }
 0x223   :  { %2137 = vpow2.f32 %v1758_v52  ;;  %v438_v56 = vsel %vm431_vm5, %v437_v54, 0.0  ;;  %v1830_v52 = vadd.f32 -0.2, %v2519_v30  ;;  %v698_v55 = vsub.f32 0.0, %v697_v37 }
 0x224   :  { %v1952_v57 = vpop.f32.mrf.mxu0  ;;  %439 = vadd.xlane.f32.xlu0 %v438_v56  ;;  %v1826_v37 = vadd.f32 0.8, %v2519_v30 }
 0x225   :  { %v722_v57 = vmul.f32 %v1778_v44, %v1778_v44  ;;  %v1285_v63 = vmul.f32 0.5, %v1830_v52  ;;  %v699_v3 = vmul.f32 1.442695, %v698_v55  ;;  %v2069_v52 = vld [vmem:[%s2878_s11 + $0x58] sm:$0xff]   ;;  %v1280_v55 = vmul.f32 0.5, %v2519_v30 }
 0x230   :  { %v2138_v58 = vpop.eup %2137 }
 0x231   :  { %v507_v59 = vadd.f32 1.0, %v2138_v58  ;;  %v1266_v58 = vmul.f32 0.5, %v1827_v45 }
 0x233   :  { %2139 = vrcp.f32 %v507_v59 }
 0x240   :  { %v2140_v60 = vpop.eup %2139 }
 0x241   :  { %v510_v61 = vmul.f32 %v2140_v60, %v424_v50 }
 0x243   :  { %v551_v62 = vpack.c.bf16 %v510_v61, %v510_v61  ;;  %v703_v61 = vsub.f32 0.0, %v702_v48 }
 0x245   :  { %1769 = vmatprep.mubr.msk.bf16.mxu1 %vm539_vm6, %v551_v62 }
 0x2ab   :  { %v434_v6 = vpop.xlane.xlu1 %433 }
 0x2ac   :  { %v436_v7 = vmul.f32 0.0625, %v434_v6 }
 0x2ad   :  { %v440_v8 = vpop.xlane.xlu0 %439 }
 0x2ae   :  { %v442_v9 = vmul.f32 %v436_v7, %v436_v7  ;;  %v441_v10 = vmul.f32 0.0625, %v440_v8  ;;  %v445_v22 = vsub.f32 %v424_v50, %v436_v7  ;;  %v2059_v7 = vld [vmem:[%s2906_s28 + $0x28] sm:$0xff]   ;;  %v704_v8 = vmul.f32 1.442695, %v703_v61 }
 0x2af   :  { %639 = vmatpush1.bf16.msra.mxu1 %v2059_v7  ;;  %v2074_v7 = vld [vmem:[%s2906_s28] sm:$0xff]  }
 0x2b0   :  { %v443_v11 = vsub.f32 %v441_v10, %v442_v9  ;;  %v723_v9 = vsub.f32 0.0, %v722_v57  ;;  %v1779_v10 = vadd.f32 -3.5, %v2503_v18  ;;  %640 = vmatprep.subr.bf16.mxu1 %v2258_v2 }
 0x2b2   :  { %v444_v13 = vmax.f32 %v443_v11, 0.0  ;;  %v724_v15 = vmul.f32 1.442695, %v723_v9  ;;  %v727_v16 = vmul.f32 %v1779_v10, %v1779_v10 }
 0x2b3   :  { %641 = vmatpush1.bf16.msra.mxu1 %v2062_v20 }
 0x2b4   :  { %v446_v14 = vadd.f32 1e-05, %v444_v13  ;;  %642 = vmatprep.subr.bf16.mxu1 %v2258_v2  ;;  %v728_v29 = vsub.f32 0.0, %v727_v16  ;;  %v2077_v16 = vld [vmem:[%s2906_s28 + $0x40] sm:$0xff]  }
 0x2b6   :  { %2141 = vrsqrt.f32 %v446_v14 }
 0x2b7   :  { %2143 = vpow2.f32 %v719_v0 }
 0x2b8   :  { %2145 = vtanh.f32 %v1256_v49 }
 0x2b9   :  { %2147 = vtanh.f32 %v1276_v51  ;;  %v1261_v51 = vmul.f32 0.5, %v1826_v37 }
 0x2c3   :  { %v2142_v23 = vpop.eup %2141 }
 0x2c4   :  { %v448_v26 = vmul.f32 %v2142_v23, %v445_v22 }
 0x2c6   :  { %v455_v31 = vmul.f32 %v1748_v25, %v448_v26  ;;  %v2064_v25 = vld [vmem:[%s2878_s11 + $0x28] sm:$0xff]   ;;  %v2065_v26 = vld [vmem:[%s2906_s28 + $0x18] sm:$0xff]  }
 0x2c7   :  { %643 = vmatpush1.bf16.msra.mxu1 %v2065_v26  ;;  %1894 = vmatpush3.bf16.msra.mxu0 %v2064_v25 }
 0x2c8   :  { %v462_v32 = vadd.f32 %v1749_v28, %v455_v31  ;;  %v2144_v28 = vpop.eup %2143  ;;  %644 = vmatprep.subr.bf16.mxu1 %v2258_v2 }
 0x2c9   :  { %v2146_v31 = vpop.eup %2145 }
 0x2ca   :  { %v2522_v34 = vmul.f32 1.75, %v462_v32  ;;  %v2148_v32 = vpop.eup %2147  ;;  %v1258_v45 = vmul.f32 %v2146_v31, %v2146_v31 }
 0x2cc   :  { %v1751_v39 = vadd.f32 2.5, %v2522_v34  ;;  %v1752_v40 = vadd.f32 1.5, %v2522_v34  ;;  %v1753_v41 = vadd.f32 0.5, %v2522_v34  ;;  %v1754_v43 = vadd.f32 -0.5, %v2522_v34 }
 0x2cd   :  { %v1755_v1 = vadd.f32 -1.5, %v2522_v34  ;;  %v1756_v6 = vadd.f32 -2.5, %v2522_v34  ;;  %v1757_v23 = vadd.f32 -3.5, %v2522_v34  ;;  %v1750_v37 = vadd.f32 3.5, %v2522_v34 }
 0x2ce   :  { %v470_v46 = vmul.f32 %v1751_v39, %v1751_v39  ;;  %v475_v47 = vmul.f32 %v1752_v40, %v1752_v40  ;;  %v480_v50 = vmul.f32 %v1753_v41, %v1753_v41  ;;  %v485_v56 = vmul.f32 %v1754_v43, %v1754_v43  ;;  %v2066_v41 = vld [vmem:[%s2878_s11 + $0x60] sm:$0xff]  }
 0x2cf   :  { %v490_v12 = vmul.f32 %v1755_v1, %v1755_v1  ;;  %v495_v14 = vmul.f32 %v1756_v6, %v1756_v6  ;;  %v500_v35 = vmul.f32 %v1757_v23, %v1757_v23  ;;  %v729_v40 = vmul.f32 1.442695, %v728_v29  ;;  %v2067_v43 = vld [vmem:[%s2878_s11 + $0x20] sm:$0xff]   ;;  %1895 = vmatprep.subr.bf16.mxu0 %v2066_v41  ;;  %v2073_v6 = vld [vmem:[%s2878_s11 + $0x10] sm:$0xff]   ;;  %v2081_v23 = vld [vmem:[%s2886_s19 + $0x78] sm:$0xff]  }
 0x2d0   :  { %v471_v53 = vsub.f32 0.0, %v470_v46  ;;  %v476_v54 = vsub.f32 0.0, %v475_v47  ;;  %v481_v62 = vsub.f32 0.0, %v480_v50  ;;  %v486_v5 = vsub.f32 0.0, %v485_v56  ;;  %v2068_v47 = vld [vmem:[%s2906_s28 + $0x10] sm:$0xff]   ;;  %1896 = vmatpush3.bf16.msra.mxu0 %v2067_v43  ;;  %v2071_v56 = vld [vmem:[%s2906_s28 + $0x8] sm:$0xff]  }
 0x2d1   :  { %v491_v21 = vsub.f32 0.0, %v490_v12  ;;  %v496_v22 = vsub.f32 0.0, %v495_v14  ;;  %v1278_v46 = vmul.f32 %v2148_v32, %v2148_v32  ;;  %v501_v49 = vsub.f32 0.0, %v500_v35  ;;  %645 = vmatpush1.bf16.msra.mxu1 %v2068_v47  ;;  %1897 = vmatprep.subr.bf16.mxu0 %v2069_v52  ;;  %v2075_v12 = vld [vmem:[%s2878_s11 + $0x48] sm:$0xff]  }
 0x2d2   :  { %v472_v59 = vmul.f32 1.442695, %v471_v53  ;;  %v477_v60 = vmul.f32 1.442695, %v476_v54  ;;  %v482_v11 = vmul.f32 1.442695, %v481_v62  ;;  %v707_v50 = vmul.f32 %v1775_v36, %v1775_v36  ;;  %646 = vmatprep.subr.bf16.mxu1 %v2258_v2 }
 0x2d3   :  { %v487_v13 = vmul.f32 1.442695, %v486_v5  ;;  %v492_v27 = vmul.f32 1.442695, %v491_v21  ;;  %v497_v33 = vmul.f32 1.442695, %v496_v22 }
 0x2d4   :  { %2149 = vpow2.f32 %v472_v59  ;;  %v2070_v54 = vld [vmem:[%s2878_s11 + $0x18] sm:$0xff]   ;;  %v1279_v59 = vsub.f32 1.0, %v1278_v46  ;;  %v2072_v62 = vld [vmem:[%s2878_s11 + $0x50] sm:$0xff]   ;;  %v502_v1 = vmul.f32 1.442695, %v501_v49  ;;  %v2079_v22 = vld [vmem:[%s2878_s11] sm:$0xff]  }
 0x2d5   :  { %2151 = vpow2.f32 %v477_v60  ;;  %1898 = vmatpush3.bf16.msra.mxu0 %v2070_v54  ;;  %647 = vmatpush1.bf16.msra.mxu1 %v2071_v56  ;;  %v1772_v43 = vadd.f32 3.5, %v2503_v18 }
 0x2d6   :  { %2153 = vtanh.f32 %v1266_v58  ;;  %v1259_v58 = vsub.f32 1.0, %v1258_v45  ;;  %1899 = vmatprep.subr.bf16.mxu0 %v2072_v62  ;;  %648 = vmatprep.subr.bf16.mxu1 %v2258_v2 }
 0x2d7   :  { %2155 = vtanh.f32 %v1285_v63  ;;  %v692_v45 = vmul.f32 %v1772_v43, %v1772_v43  ;;  %v2086_v43 = vld [vmem:[%s2886_s19 + $0x68] sm:$0xff]  }
 0x2d8   :  { %2157 = vpow2.f32 %v699_v3  ;;  %v708_v3 = vsub.f32 0.0, %v707_v50  ;;  %v2022_v9 = vpack.i.bf16 %v1259_v58, %v1279_v59  ;;  %v1828_v50 = vadd.f32 0.4, %v2519_v30 }
 0x2d9   :  { %2159 = vpow2.f32 %v704_v8  ;;  %1900 = vmatpush3.bf16.msra.mxu0 %v2073_v6  ;;  %649 = vmatpush1.bf16.msra.mxu1 %v2074_v7 }
 0x2da   :  { %2161 = vpow2.f32 %v482_v11  ;;  %v709_v14 = vmul.f32 1.442695, %v708_v3  ;;  %1901 = vmatprep.subr.bf16.mxu0 %v2075_v12  ;;  %664 = vmatprep.subr.bf16.mxu1 %v2258_v2  ;;  %v1271_v52 = vmul.f32 0.5, %v1828_v50 }
 0x2db   :  { %2163 = vpow2.f32 %v487_v13 }
 0x2dc   :  { %2165 = vpow2.f32 %v724_v15  ;;  %v2076_v15 = vld [vmem:[%s2878_s11 + $0x8] sm:$0xff]  }
 0x2dd   :  { %2167 = vpow2.f32 %v492_v27  ;;  %1902 = vmatpush3.bf16.msra.mxu0 %v2076_v15  ;;  %665 = vmatpush2.bf16.msra.mxu1 %v2077_v16 }
 0x2de   :  { %2169 = vpow2.f32 %v497_v33  ;;  %1903 = vmatprep.subr.bf16.mxu0 %v2078_v19  ;;  %1953 = vmatprep.subr.bf16.mxu1 %v2254_v4  ;;  %v1824_v19 = vadd.f32 1.2, %v2519_v30  ;;  %v2082_v30 = vld [vmem:[%s2886_s19 + $0x38] sm:$0xff]  }
 0x2df   :  { %2171 = vpow2.f32 %v729_v40 }
 0x2e0   :  { %2173 = vtanh.f32 %v1261_v51 }
 0x2e1   :  { %v2150_v38 = vpop.eup %2149  ;;  %2175 = vtanh.f32 %v1280_v55  ;;  %1904 = vmatpush3.bf16.msra.mxu0 %v2079_v22  ;;  %v2080_v22 = vld [vmem:[%s2878_s11 + $0x88] sm:$0xff]  }
 0x2e2   :  { %v2152_v39 = vpop.eup %2151  ;;  %512 = vrot.lane.b32.xlu1 %v2150_v38, %s2259_s2  ;;  %2177 = vpow2.f32 %v502_v1  ;;  %1914 = vmatprep.subr.bf16.mxu0 %v2081_v23  ;;  %v465_v38 = vmul.f32 %v1750_v37, %v1750_v37 }
 0x2e3   :  { %v2154_v0 = vpop.eup %2153  ;;  %v2007_v44 = vpack.i.bf16 %v2144_v28, %v2152_v39  ;;  %2179 = vpow2.f32 %v709_v14  ;;  %v1776_v39 = vadd.f32 -0.5, %v2503_v18 }
 0x2e4   :  { %v2156_v48 = vpop.eup %2155  ;;  %v1268_v60 = vmul.f32 %v2154_v0, %v2154_v0  ;;  %v466_v40 = vsub.f32 0.0, %v465_v38 }
 0x2e5   :  { %v2158_v53 = vpop.eup %2157  ;;  %2008 = vrot.lane.b32.xlu0 %v2007_v44, %s2255_s4  ;;  %v1287_v61 = vmul.f32 %v2156_v48, %v2156_v48  ;;  %v712_v41 = vmul.f32 %v1776_v39, %v1776_v39  ;;  %v693_v48 = vsub.f32 0.0, %v692_v45  ;;  %v2085_v39 = vld [vmem:[%s2886_s19 + $0x30] sm:$0xff]  }
 0x2e6   :  { %732 = vrot.lane.b32.xlu1 %v2158_v53, %s2255_s4  ;;  %v2160_v57 = vpop.eup %2159  ;;  %v1269_v10 = vsub.f32 1.0, %v1268_v60  ;;  %v467_v0 = vmul.f32 1.442695, %v466_v40 }
 0x2e7   :  { %v2162_v63 = vpop.eup %2161  ;;  %v1288_v11 = vsub.f32 1.0, %v1287_v61  ;;  %v713_v44 = vsub.f32 0.0, %v712_v41  ;;  %v694_v51 = vmul.f32 1.442695, %v693_v48  ;;  %v2089_v48 = vld [vmem:[%s2886_s19 + $0x20] sm:$0xff]  }
 0x2e8   :  { %v2164_v5 = vpop.eup %2163  ;;  %2181 = vpow2.f32 %v467_v0 }
 0x2e9   :  { %736 = vrot.lane.b32.xlu0 %v2160_v57, %s2256_s30  ;;  %v2166_v8 = vpop.eup %2165  ;;  %v2032_v17 = vpack.i.bf16 %v1269_v10, %v1288_v11  ;;  %v714_v47 = vmul.f32 1.442695, %v713_v44 }
 0x2ea   :  { %520 = vrot.lane.b32.xlu1 %v2162_v63, %s2260_s6  ;;  %v2012_v13 = vpack.i.bf16 %v2166_v8, %v2164_v5  ;;  %v2168_v20 = vpop.eup %2167 }
 0x2eb   :  { %v2170_v21 = vpop.eup %2169  ;;  %2183 = vpow2.f32 %v714_v47  ;;  %v2088_v47 = vld [vmem:[%s2886_s19 + $0x60] sm:$0xff]  }
 0x2ec   :  { %v2172_v24 = vpop.eup %2171  ;;  %2185 = vpow2.f32 %v694_v51  ;;  %v2092_v51 = vld [vmem:[%s2886_s19 + $0x50] sm:$0xff]  }
 0x2ed   :  { %2023 = vrot.lane.b32.xlu0 %v2022_v9, %s2255_s4  ;;  %v2017_v25 = vpack.i.bf16 %v2172_v24, %v2170_v21  ;;  %v2174_v26 = vpop.eup %2173  ;;  %2187 = vtanh.f32 %v1271_v52  ;;  %v2093_v52 = vld [vmem:[%s2886_s19 + $0x10] sm:$0xff]  }
 0x2ee   :  { %2013 = vrot.lane.b32.xlu1 %v2012_v13, %s2256_s30  ;;  %v2176_v28 = vpop.eup %2175  ;;  %v1263_v29 = vmul.f32 %v2174_v26, %v2174_v26 }
 0x2ef   :  { %v2178_v31 = vpop.eup %2177  ;;  %v1282_v27 = vmul.f32 %v2176_v28, %v2176_v28  ;;  %v1251_v28 = vmul.f32 0.5, %v1824_v19 }
 0x2f0   :  { %v1264_v32 = vsub.f32 1.0, %v1263_v29  ;;  %v2180_v33 = vpop.eup %2179 }
 0x2f1   :  { %2033 = vrot.lane.b32.xlu0 %v2032_v17, %s2253_s0  ;;  %v1283_v35 = vsub.f32 1.0, %v1282_v27  ;;  %2189 = vtanh.f32 %v1251_v28 }
 0x2f2   :  { %528 = vrot.lane.b32.xlu1 %v2168_v20, %s2261_s18 }
 0x2f3   :  { %v2027_v36 = vpack.i.bf16 %v1264_v32, %v1283_v35 }
 0x2f5   :  { %v2182_v18 = vpop.eup %2181 }
 0x2f6   :  { %2018 = vrot.lane.b32.xlu1 %v2017_v25, %s2253_s0 }
 0x2f8   :  { %v2184_v3 = vpop.eup %2183 }
 0x2f9   :  { %v2186_v13 = vpop.eup %2185 }
 0x2fa   :  { %536 = vrot.lane.b32.xlu1 %v2178_v31, %s2262_s1  ;;  %v2188_v16 = vpop.eup %2187  ;;  %v2083_v31 = vld [vmem:[%s2878_s11 + $0x80] sm:$0xff]  }
 0x2fb   :  { %v1273_v25 = vmul.f32 %v2188_v16, %v2188_v16 }
 0x2fe   :  { %740 = vrot.lane.b32.xlu1 %v2180_v33, %s2253_s0  ;;  %v2084_v33 = vld [vmem:[%s2886_s19 + $0x70] sm:$0xff]   ;;  %v2190_v50 = vpop.eup %2189 }
 0x302   :  { %2028 = vrot.lane.b32.xlu1 %v2027_v36, %s2256_s30  ;;  %v1274_v36 = vsub.f32 1.0, %v1273_v25 }
 0x354   :  { %v513_v46 = vpop.permute.xlu1 %512 }
 0x355   :  { %v540_v57 = vsel %vm539_vm6, %v2182_v18, %v513_v46  ;;  %v2087_v46 = vld [vmem:[%s2886_s19 + $0x28] sm:$0xff]  }
 0x357   :  { %v2009_v53 = vpop.permute.xlu0 %2008 }
 0x358   :  { %v733_v49 = vpop.permute.xlu1 %732  ;;  %v2010_v55 = vunpack.i.l.bf16 %v2009_v53  ;;  %v2011_v59 = vunpack.i.h.bf16 %v2009_v53  ;;  %v2094_v53 = vld [vmem:[%s2886_s19 + $0x48] sm:$0xff]  }
 0x359   :  { %v755_v17 = vsel %vm183_vm1, %v2186_v13, %v733_v49  ;;  %v2091_v49 = vld [vmem:[%s2886_s19 + $0x18] sm:$0xff]  }
 0x35a   :  { %v541_v60 = vsel %vm183_vm1, %v540_v57, %v2010_v55  ;;  %v758_v6 = vsel %vm183_vm1, %v2184_v3, %v2011_v59  ;;  %v2096_v57 = vld [vmem:[%s2886_s19 + $0x40] sm:$0xff]  }
 0x35b   :  { %v737_v63 = vpop.permute.xlu0 %736 }
 0x35c   :  { %v521_v34 = vpop.permute.xlu1 %520  ;;  %v756_v24 = vsel %vm185_vm2, %v755_v17, %v737_v63 }
 0x35d   :  { %v543_v61 = vsel %vm542_vm7, %v541_v60, %v521_v34  ;;  %v1253_v34 = vmul.f32 %v2190_v50, %v2190_v50 }
 0x35f   :  { %v2642_v20 = vpop.permute.xlu0 %2023  ;;  %v1254_v18 = vsub.f32 1.0, %v1253_v34 }
 0x360   :  { %v2014_v54 = vpop.permute.xlu1 %2013  ;;  %v2025_v27 = vunpack.i.l.bf16 %v2642_v20 }
 0x361   :  { %v2015_v56 = vunpack.i.l.bf16 %v2014_v54  ;;  %v2016_v62 = vunpack.i.h.bf16 %v2014_v54  ;;  %v2026_v54 = vunpack.i.h.bf16 %v2642_v20 }
 0x362   :  { %v1316_v40 = vsel %vm183_vm1, %v1274_v36, %v2025_v27 }
 0x363   :  { %v544_v1 = vsel %vm185_vm2, %v543_v61, %v2015_v56  ;;  %v759_v9 = vsel %vm185_vm2, %v758_v6, %v2016_v62  ;;  %v2034_v35 = vpop.permute.xlu0 %2033  ;;  %v2095_v56 = vld [vmem:[%s2886_s19 + $0x8] sm:$0xff]   ;;  %v2097_v61 = vld [vmem:[%s2886_s19] sm:$0xff]  }
 0x364   :  { %v529_v58 = vpop.permute.xlu1 %528  ;;  %v2035_v41 = vunpack.i.l.bf16 %v2034_v35  ;;  %v2036_v60 = vunpack.i.h.bf16 %v2034_v35 }
 0x365   :  { %v546_v10 = vsel %vm545_vm8, %v544_v1, %v529_v58  ;;  %v1313_v58 = vsel %vm183_vm1, %v1254_v18, %v2026_v54  ;;  %v1801_v54 = vld [vmem:[%s2881_s14] ss:$0 sm:$0xff] }
 0x368   :  { %v2019_v5 = vpop.permute.xlu1 %2018 }
 0x369   :  { %v2021_v7 = vunpack.i.h.bf16 %v2019_v5  ;;  %v2020_v8 = vunpack.i.l.bf16 %v2019_v5 }
 0x36b   :  { %v547_v11 = vsel %vm187_vm3, %v546_v10, %v2020_v8  ;;  %v760_v12 = vsel %vm187_vm3, %v759_v9, %v2021_v7  ;;  %v1780_v9 = vld [vmem:[%s2879_s12] ss:$0 sm:$0xff] }
 0x36c   :  { %v537_v14 = vpop.permute.xlu1 %536  ;;  %v762_v15 = vpack.c.bf16 %v760_v12, %v760_v12 }
 0x36d   :  { %v549_v21 = vsel %vm548_vm9, %v547_v11, %v537_v14 }
 0x36e   :  { %v550_v23 = vpack.c.bf16 %v549_v21, %v549_v21  ;;  %946 = vmatprep.mubr.bf16.mxu0 %v762_v15 }
 0x370   :  { %v741_v26 = vpop.permute.xlu1 %740  ;;  %667 = vmatmul.mubr.bf16.vlgmr.msra.gmra.mxu1 %v550_v23 }
 0x371   :  { %v757_v29 = vsel %vm187_vm3, %v756_v24, %v741_v26  ;;  %1954 = vmatpush3.bf16.msra.mxu1 %v2080_v22  ;;  %1957 = vmatprep.mubr.msk.bf16.mxu1 %vm2257_vm4, %v2254_v4 }
 0x372   :  { %v761_v32 = vpack.c.bf16 %v757_v29, %v757_v29  ;;  %1955 = vmatprep.subr.bf16.mxu1 %v2254_v4 }
 0x374   :  { %v2029_v37 = vpop.permute.xlu1 %2028  ;;  %947 = vmatmul.mubr.bf16.vlgmr.msra.gmra.mxu0 %v761_v32 }
 0x375   :  { %v2030_v38 = vunpack.i.l.bf16 %v2029_v37  ;;  %1915 = vmatpush3.bf16.msra.mxu0 %v2082_v30  ;;  %1956 = vmatpush3.bf16.msra.mxu1 %v2083_v31  ;;  %v2031_v55 = vunpack.i.h.bf16 %v2029_v37 }
 0x376   :  { %1916 = vmatprep.subr.bf16.mxu0 %v2084_v33  ;;  %1193 = vmatprep.subr.bf16.mxu1 %v2258_v2 }
 0x377   :  { %v1317_v0 = vsel %vm185_vm2, %v1316_v40, %v2030_v38  ;;  %v1314_v59 = vsel %vm185_vm2, %v1313_v58, %v2031_v55  ;;  %v2098_v38 = vld [vmem:[%s2882_s15 + $0x38] sm:$0xff]   ;;  %v2100_v40 = vld [vmem:[%s2882_s15 + $0x28] sm:$0xff]  }
 0x378   :  { %1958 = vmatmul.mubr.msk.bf16.vlgmr.msra.gmra.mxu1 %vm183_vm1, %v2471_v42  ;;  %v1318_v44 = vsel %vm187_vm3, %v1317_v0, %v2035_v41  ;;  %v2090_v42 = vld [vmem:[%s2886_s19 + $0x58] sm:$0xff]   ;;  %v1315_v62 = vsel %vm187_vm3, %v1314_v59, %v2036_v60  ;;  %v2101_v41 = vld [vmem:[%s2882_s15 + $0x20] sm:$0xff]   ;;  %v2103_v0 = vld [vmem:[%s2882_s15 + $0x10] sm:$0xff]  }
 0x379   :  { %1917 = vmatpush3.bf16.msra.mxu0 %v2085_v39  ;;  %v1320_v45 = vpack.c.bf16 %v1318_v44, %v1318_v44  ;;  %v1319_v63 = vpack.c.bf16 %v1315_v62, %v1315_v62  ;;  %1194 = vmatpush1.bf16.msra.mxu1 %v2098_v38  ;;  %v2099_v39 = vld [vmem:[%s2882_s15 + $0x30] sm:$0xff]   ;;  %v2106_v38 = vld [vmem:[%s2882_s15 + $0x40] sm:$0xff]  }
 0x37a   :  { %1918 = vmatprep.subr.bf16.mxu0 %v2086_v43  ;;  %1195 = vmatprep.subr.bf16.mxu1 %v2258_v2  ;;  %v2102_v43 = vld [vmem:[%s2882_s15 + $0x18] sm:$0xff]  }
 0x37b   :  { %1481 = vmatprep.mubr.bf16.mxu0 %v1320_v45 }
 0x37d   :  { %1919 = vmatpush3.bf16.msra.mxu0 %v2087_v46  ;;  %1196 = vmatpush1.bf16.msra.mxu1 %v2099_v39 }
 0x37e   :  { %1920 = vmatprep.subr.bf16.mxu0 %v2088_v47  ;;  %1197 = vmatprep.subr.bf16.mxu1 %v2258_v2 }
 0x381   :  { %1921 = vmatpush3.bf16.msra.mxu0 %v2089_v48  ;;  %1198 = vmatpush1.bf16.msra.mxu1 %v2100_v40 }
 0x382   :  { %1922 = vmatprep.subr.bf16.mxu0 %v2090_v42  ;;  %1199 = vmatprep.subr.bf16.mxu1 %v2258_v2 }
 0x385   :  { %1923 = vmatpush3.bf16.msra.mxu0 %v2091_v49  ;;  %1200 = vmatpush1.bf16.msra.mxu1 %v2101_v41  ;;  %v1847_v41 = vld [vmem:[%s2887_s20] ss:$0 sm:$0xff] }
 0x386   :  { %1924 = vmatprep.subr.bf16.mxu0 %v2092_v51  ;;  %1201 = vmatprep.subr.bf16.mxu1 %v2258_v2 }
 0x389   :  { %1925 = vmatpush3.bf16.msra.mxu0 %v2093_v52  ;;  %1202 = vmatpush1.bf16.msra.mxu1 %v2102_v43  ;;  %v1800_v52 = vld [vmem:[%s2880_s13] ss:$0 sm:$0xff] }
 0x38a   :  { %1926 = vmatprep.subr.bf16.mxu0 %v2094_v53  ;;  %1203 = vmatprep.subr.bf16.mxu1 %v2258_v2 }
 0x38d   :  { %1927 = vmatpush3.bf16.msra.mxu0 %v2095_v56  ;;  %1204 = vmatpush1.bf16.msra.mxu1 %v2103_v0 }
 0x38e   :  { %1928 = vmatprep.subr.bf16.mxu0 %v2096_v57  ;;  %1205 = vmatprep.subr.bf16.mxu1 %v2258_v2 }
 0x391   :  { %1929 = vmatpush3.bf16.msra.mxu0 %v2097_v61 }
 0x394   :  { %1482 = vmatmul.mubr.bf16.vlgmr.msra.gmra.mxu0 %v1319_v63 }
 0x430   :  { %v2712_v1 = vpop.f32.mrf.mxu1 }
 0x432   :  { %v670_v3 = vpop.f32.mrf.mxu1 }
 0x434   :  { %v671_v5 = vpop.f32.mrf.mxu1  ;;  %v1905_v6 = vpop.f32.mrf.mxu0 }
 0x436   :  { %v672_v7 = vpop.f32.mrf.mxu1  ;;  %v1906_v8 = vpop.f32.mrf.mxu0 }
 0x437   :  { %v1907_v10 = vadd.f32 %v1906_v8, %v1905_v6 }
 0x438   :  { %v1908_v11 = vpop.f32.mrf.mxu0  ;;  %v988_v12 = vpop.f32.mrf.mxu1 }
 0x439   :  { %v949_v13 = vadd.f32 %v1907_v10, %v1780_v9 }
 0x43a   :  { %v1909_v14 = vpop.f32.mrf.mxu0  ;;  %v1959_v15 = vpop.f32.mrf.mxu1 }
 0x43b   :  { %v989_v16 = vadd.f32 %v988_v12, %v949_v13 }
 0x43c   :  { %v991_v17 = vpop.f32.mrf.mxu1 }
 0x43d   :  { %v1810_v19 = vmul.f32 -1.442695, %v989_v16  ;;  %v996_v20 = vsel %vm431_vm5, %v989_v16, 0.0  ;;  %v1000_v21 = vmul.f32 %v989_v16, %v989_v16 }
 0x43e   :  { %997 = vadd.xlane.f32.xlu1 %v996_v20  ;;  %v1960_v22 = vpop.f32.mrf.mxu1 }
 0x43f   :  { %2191 = vpow2.f32 %v1810_v19  ;;  %v1001_v23 = vsel %vm431_vm5, %v1000_v21, 0.0 }
 0x440   :  { %1002 = vadd.xlane.f32.xlu0 %v1001_v23 }
 0x44c   :  { %v2192_v24 = vpop.eup %2191 }
 0x44d   :  { %v1070_v25 = vadd.f32 1.0, %v2192_v24 }
 0x44f   :  { %2193 = vrcp.f32 %v1070_v25 }
 0x454   :  { %v1930_v26 = vpop.f32.mrf.mxu0 }
 0x456   :  { %v1931_v28 = vpop.f32.mrf.mxu0 }
 0x457   :  { %v2719_v29 = vadd.f32 %v1931_v28, %v1930_v26 }
 0x458   :  { %v1933_v30 = vpop.f32.mrf.mxu0 }
 0x459   :  { %v1491_v31 = vsel %vm431_vm5, %v2719_v29, 0.0  ;;  %v1495_v27 = vmul.f32 %v2719_v29, %v2719_v29 }
 0x45a   :  { %v1934_v32 = vpop.f32.mrf.mxu0  ;;  %1492 = vadd.xlane.f32.xlu0 %v1491_v31 }
 0x45b   :  { %v1496_v33 = vsel %vm431_vm5, %v1495_v27, 0.0  ;;  %v2104_v27 = vld [vmem:[%s2882_s15 + $0x8] sm:$0xff]  }
 0x45c   :  { %v2194_v35 = vpop.eup %2193  ;;  %1497 = vadd.xlane.f32.xlu1 %v1496_v33  ;;  %1206 = vmatpush1.bf16.msra.mxu1 %v2104_v27 }
 0x45d   :  { %v1073_v36 = vmul.f32 %v2194_v35, %v989_v16  ;;  %1207 = vmatprep.subr.bf16.mxu1 %v2258_v2 }
 0x45f   :  { %v1110_v37 = vpack.c.bf16 %v1073_v36, %v1073_v36  ;;  %v2105_v36 = vld [vmem:[%s2882_s15] sm:$0xff]  }
 0x460   :  { %1208 = vmatpush1.bf16.msra.mxu1 %v2105_v36 }
 0x461   :  { %1821 = vmatprep.mubr.msk.bf16.mxu1 %vm539_vm6, %v1110_v37  ;;  %1223 = vmatprep.subr.bf16.mxu1 %v2258_v2 }
 0x464   :  { %1224 = vmatpush2.bf16.msra.mxu1 %v2106_v38 }
 0x465   :  { %1961 = vmatprep.subr.bf16.mxu1 %v2254_v4 }
 0x4c7   :  { %v998_v44 = vpop.xlane.xlu1 %997 }
 0x4c8   :  { %v999_v45 = vmul.f32 0.0625, %v998_v44  ;;  %v1848_v44 = vld [vmem:[%s2888_s21] ss:$0 sm:$0xff] }
 0x4c9   :  { %v1003_v46 = vpop.xlane.xlu0 %1002 }
 0x4ca   :  { %v1005_v47 = vmul.f32 %v999_v45, %v999_v45  ;;  %v1004_v48 = vmul.f32 0.0625, %v1003_v46  ;;  %v1008_v51 = vsub.f32 %v989_v16, %v999_v45 }
 0x4cc   :  { %v1006_v42 = vsub.f32 %v1004_v48, %v1005_v47 }
 0x4ce   :  { %v1007_v49 = vmax.f32 %v1006_v42, 0.0 }
 0x4d0   :  { %v1009_v50 = vadd.f32 1e-05, %v1007_v49 }
 0x4d2   :  { %2195 = vrsqrt.f32 %v1009_v50 }
 0x4df   :  { %v2196_v34 = vpop.eup %2195 }
 0x4e0   :  { %v1011_v53 = vmul.f32 %v2196_v34, %v1008_v51 }
 0x4e2   :  { %v1018_v55 = vmul.f32 %v1800_v52, %v1011_v53 }
 0x4e3   :  { %v1493_v18 = vpop.xlane.xlu0 %1492 }
 0x4e4   :  { %v1025_v56 = vadd.f32 %v1801_v54, %v1018_v55  ;;  %v1494_v57 = vmul.f32 0.0625, %v1493_v18 }
 0x4e5   :  { %v1498_v58 = vpop.xlane.xlu1 %1497 }
 0x4e6   :  { %v2757_v59 = vmul.f32 1.75, %v1025_v56  ;;  %v1500_v60 = vmul.f32 %v1494_v57, %v1494_v57  ;;  %v1499_v61 = vmul.f32 0.0625, %v1498_v58  ;;  %v1503_v39 = vsub.f32 %v2719_v29, %v1494_v57 }
 0x4e8   :  { %v1501_v62 = vsub.f32 %v1499_v61, %v1500_v60  ;;  %v1804_v63 = vadd.f32 1.5, %v2757_v59  ;;  %v1803_v3 = vadd.f32 2.5, %v2757_v59  ;;  %v1805_v5 = vadd.f32 0.5, %v2757_v59 }
 0x4e9   :  { %v1806_v6 = vadd.f32 -0.5, %v2757_v59  ;;  %v1807_v7 = vadd.f32 -1.5, %v2757_v59  ;;  %v1808_v8 = vadd.f32 -2.5, %v2757_v59  ;;  %v1809_v15 = vadd.f32 -3.5, %v2757_v59 }
 0x4ea   :  { %v1502_v9 = vmax.f32 %v1501_v62, 0.0  ;;  %v1038_v10 = vmul.f32 %v1804_v63, %v1804_v63  ;;  %v1033_v11 = vmul.f32 %v1803_v3, %v1803_v3  ;;  %v1043_v12 = vmul.f32 %v1805_v5, %v1805_v5 }
 0x4eb   :  { %v1048_v13 = vmul.f32 %v1806_v6, %v1806_v6  ;;  %v1053_v14 = vmul.f32 %v1807_v7, %v1807_v7  ;;  %v1058_v22 = vmul.f32 %v1808_v8, %v1808_v8  ;;  %v1063_v28 = vmul.f32 %v1809_v15, %v1809_v15 }
 0x4ec   :  { %v1504_v16 = vadd.f32 1e-05, %v1502_v9  ;;  %v1039_v17 = vsub.f32 0.0, %v1038_v10  ;;  %v1034_v19 = vsub.f32 0.0, %v1033_v11  ;;  %v1044_v20 = vsub.f32 0.0, %v1043_v12 }
 0x4ed   :  { %v1049_v21 = vsub.f32 0.0, %v1048_v13  ;;  %v1054_v26 = vsub.f32 0.0, %v1053_v14  ;;  %v1059_v31 = vsub.f32 0.0, %v1058_v22  ;;  %v1064_v33 = vsub.f32 0.0, %v1063_v28 }
 0x4ee   :  { %2197 = vrsqrt.f32 %v1504_v16  ;;  %v1040_v23 = vmul.f32 1.442695, %v1039_v17  ;;  %v1035_v24 = vmul.f32 1.442695, %v1034_v19  ;;  %v1045_v25 = vmul.f32 1.442695, %v1044_v20 }
 0x4ef   :  { %v1050_v30 = vmul.f32 1.442695, %v1049_v21  ;;  %v1055_v32 = vmul.f32 1.442695, %v1054_v26  ;;  %v1060_v35 = vmul.f32 1.442695, %v1059_v31 }
 0x4f0   :  { %2199 = vpow2.f32 %v1040_v23  ;;  %v1065_v37 = vmul.f32 1.442695, %v1064_v33 }
 0x4f1   :  { %2201 = vpow2.f32 %v1035_v24  ;;  %v1802_v24 = vadd.f32 3.5, %v2757_v59 }
 0x4f2   :  { %2203 = vpow2.f32 %v1045_v25 }
 0x4f3   :  { %2205 = vpow2.f32 %v1050_v30  ;;  %v1028_v25 = vmul.f32 %v1802_v24, %v1802_v24 }
 0x4f4   :  { %2207 = vpow2.f32 %v1055_v32 }
 0x4f5   :  { %2209 = vpow2.f32 %v1060_v35  ;;  %v1029_v26 = vsub.f32 0.0, %v1028_v25 }
 0x4f6   :  { %2211 = vpow2.f32 %v1065_v37 }
 0x4f7   :  { %v1030_v28 = vmul.f32 1.442695, %v1029_v26 }
 0x4fb   :  { %v2198_v40 = vpop.eup %2197 }
 0x4fc   :  { %v1506_v43 = vmul.f32 %v2198_v40, %v1503_v39 }
 0x4fd   :  { %v2200_v0 = vpop.eup %2199 }
 0x4fe   :  { %v2202_v45 = vpop.eup %2201  ;;  %v1513_v46 = vmul.f32 %v1847_v41, %v1506_v43  ;;  %1079 = vrot.lane.b32.xlu1 %v2200_v0, %s2255_s4 }
 0x4ff   :  { %1075 = vrot.lane.b32.xlu0 %v2202_v45, %s2259_s2  ;;  %v2204_v29 = vpop.eup %2203 }
 0x500   :  { %v2787_v2 = vadd.f32 %v1848_v44, %v1513_v46  ;;  %v2206_v47 = vpop.eup %2205  ;;  %v2107_v46 = vld [vmem:[%s2889_s22 + $0x38] sm:$0xff]  }
 0x501   :  { %v2208_v54 = vpop.eup %2207 }
 0x502   :  { %1083 = vrot.lane.b32.xlu1 %v2204_v29, %s2260_s6  ;;  %v1851_v48 = vadd.f32 0.8, %v2787_v2  ;;  %v1850_v42 = vadd.f32 1.0, %v2787_v2  ;;  %v1853_v49 = vadd.f32 0.4, %v2787_v2  ;;  %v2210_v18 = vpop.eup %2209  ;;  %v1551_v56 = vmul.f32 0.5, %v2787_v2 }
 0x503   :  { %1087 = vrot.lane.b32.xlu0 %v2206_v47, %s2256_s30  ;;  %v1852_v50 = vadd.f32 0.6, %v2787_v2  ;;  %v1854_v51 = vadd.f32 0.2, %v2787_v2  ;;  %v1855_v58 = vadd.f32 -0.2, %v2787_v2  ;;  %v2212_v60 = vpop.eup %2211 }
 0x504   :  { %v1532_v34 = vmul.f32 0.5, %v1851_v48  ;;  %v1527_v52 = vmul.f32 0.5, %v1850_v42  ;;  %v1542_v53 = vmul.f32 0.5, %v1853_v49  ;;  %v1849_v32 = vadd.f32 1.2, %v2787_v2  ;;  %v2108_v29 = vld [vmem:[%s2889_s22 + $0x30] sm:$0xff]  }
 0x505   :  { %v1537_v55 = vmul.f32 0.5, %v1852_v50  ;;  %v1547_v57 = vmul.f32 0.5, %v1854_v51  ;;  %v1556_v61 = vmul.f32 0.5, %v1855_v58  ;;  %v2109_v47 = vld [vmem:[%s2889_s22 + $0x28] sm:$0xff]   ;;  %v2110_v49 = vld [vmem:[%s2889_s22 + $0x20] sm:$0xff]  }
 0x506   :  { %1091 = vrot.lane.b32.xlu1 %v2208_v54, %s2261_s18  ;;  %2213 = vtanh.f32 %v1532_v34  ;;  %v1522_v39 = vmul.f32 0.5, %v1849_v32 }
 0x507   :  { %1095 = vrot.lane.b32.xlu0 %v2210_v18, %s2253_s0  ;;  %2215 = vtanh.f32 %v1527_v52  ;;  %v2111_v52 = vld [vmem:[%s2889_s22 + $0x18] sm:$0xff]   ;;  %v2112_v18 = vld [vmem:[%s2889_s22 + $0x10] sm:$0xff]  }
 0x508   :  { %2217 = vtanh.f32 %v1542_v53 }
 0x509   :  { %2219 = vtanh.f32 %v1537_v55 }
 0x50a   :  { %1099 = vrot.lane.b32.xlu1 %v2212_v60, %s2262_s1  ;;  %2221 = vtanh.f32 %v1551_v56  ;;  %v2113_v60 = vld [vmem:[%s2889_s22 + $0x8] sm:$0xff]  }
 0x50b   :  { %2223 = vtanh.f32 %v1547_v57 }
 0x50c   :  { %2225 = vtanh.f32 %v1556_v61 }
 0x50d   :  { %2227 = vpow2.f32 %v1030_v28 }
 0x50e   :  { %2229 = vtanh.f32 %v1522_v39 }
 0x513   :  { %v2214_v62 = vpop.eup %2213 }
 0x514   :  { %v2216_v63 = vpop.eup %2215  ;;  %v1534_v3 = vmul.f32 %v2214_v62, %v2214_v62 }
 0x515   :  { %v2218_v5 = vpop.eup %2217  ;;  %v1529_v6 = vmul.f32 %v2216_v63, %v2216_v63 }
 0x516   :  { %v2220_v7 = vpop.eup %2219  ;;  %v1535_v8 = vsub.f32 1.0, %v1534_v3  ;;  %v1544_v9 = vmul.f32 %v2218_v5, %v2218_v5  ;;  %v2114_v5 = vld [vmem:[%s2889_s22] sm:$0xff]   ;;  %s2263_s22 = smov [#allocation2]  }
 0x517   :  { %v2222_v10 = vpop.eup %2221  ;;  %v1530_v11 = vsub.f32 1.0, %v1529_v6  ;;  %v1539_v12 = vmul.f32 %v2220_v7, %v2220_v7  ;;  %s1709_s17 = sshll.u32 %s2263_s22, 4  ;;  %s1710_s17 = int_to_ptr.vmem [resolvable:$true] %s1709_s17 }
 0x518   :  { %v2224_v13 = vpop.eup %2223  ;;  %1565 = vrot.lane.b32.xlu1 %v1535_v8, %s2255_s4  ;;  %v1545_v14 = vsub.f32 1.0, %v1544_v9  ;;  %v1553_v15 = vmul.f32 %v2222_v10, %v2222_v10  ;;  %s2231_s28 = scalar_lea.vmem %s1710_s17, 32  ;;  %p2236_p1 = scmp.lt.s32.totalorder %s1710_s17, %s1710_s17 }
 0x519   :  { %1561 = vrot.lane.b32.xlu0 %v1530_v11, %s2259_s2  ;;  %v1540_v16 = vsub.f32 1.0, %v1539_v12  ;;  %v1549_v17 = vmul.f32 %v2224_v13, %v2224_v13  ;;  %v2226_v19 = vpop.eup %2225  ;;  %v1811_v13 = vld [vmem:[%s2883_s16] ss:$0 sm:$0xff]  ;;  %p2232_p0 = scmp.ne.s32.totalorder %s1710_s17, %s2231_s28  ;;  %p2237_p2 = scmp.lt.s32.totalorder %s2231_s28, %s2231_s28 }
 0x51a   :  { %v1554_v20 = vsub.f32 1.0, %v1553_v15  ;;  %v1558_v22 = vmul.f32 %v2226_v19, %v2226_v19  ;;  %v2228_v31 = vpop.eup %2227 }
 0x51b   :  { %v1550_v21 = vsub.f32 1.0, %v1549_v17  ;;  %v2230_v48 = vpop.eup %2229  ;;  %p2238_p3 = por %p2237_p2, %p2236_p1 }
 0x51c   :  { %1573 = vrot.lane.b32.xlu1 %v1545_v14, %s2256_s30  ;;  %v1559_v23 = vsub.f32 1.0, %v1558_v22  ;;  %v1524_v42 = vmul.f32 %v2230_v48, %v2230_v48  ;;  %v1759_v14 = vld [vmem:[%s2875_s8] ss:$0 sm:$0xff] }
 0x51d   :  { %1569 = vrot.lane.b32.xlu0 %v1540_v16, %s2260_s6  ;;  %p2239_p4 = pnand %p2238_p3, %p2232_p0 }
 0x51e   :  { %v1525_v34 = vsub.f32 1.0, %v1524_v42 }
 0x520   :  { %1581 = vrot.lane.b32.xlu1 %v1554_v20, %s2253_s0 }
 0x521   :  { %1577 = vrot.lane.b32.xlu0 %v1550_v21, %s2261_s18 }
 0x525   :  { %1585 = vrot.lane.b32.xlu0 %v1559_v23, %s2262_s1 }
 0x570   :  { %v1080_v30 = vpop.permute.xlu1 %1079 }
 0x571   :  { %v1076_v27 = vpop.permute.xlu0 %1075 }
 0x572   :  { %v1102_v33 = vsel %vm539_vm6, %v2228_v31, %v1076_v27 }
 0x573   :  { %v1103_v35 = vsel %vm183_vm1, %v1102_v33, %v1080_v30 }
 0x574   :  { %v1084_v36 = vpop.permute.xlu1 %1083 }
 0x575   :  { %v1088_v37 = vpop.permute.xlu0 %1087  ;;  %v1104_v38 = vsel %vm542_vm7, %v1103_v35, %v1084_v36 }
 0x576   :  { %v1105_v59 = vsel %vm185_vm2, %v1104_v38, %v1088_v37 }
 0x578   :  { %v1092_v40 = vpop.permute.xlu1 %1091 }
 0x579   :  { %v1096_v41 = vpop.permute.xlu0 %1095  ;;  %v1106_v43 = vsel %vm545_vm8, %v1105_v59, %v1092_v40 }
 0x57a   :  { %v1107_v0 = vsel %vm187_vm3, %v1106_v43, %v1096_v41 }
 0x57c   :  { %v1100_v44 = vpop.permute.xlu1 %1099 }
 0x57d   :  { %v1108_v45 = vsel %vm548_vm9, %v1107_v0, %v1100_v44 }
 0x57e   :  { %v1109_v2 = vpack.c.bf16 %v1108_v45, %v1108_v45 }
 0x580   :  { %1226 = vmatmul.mubr.bf16.vlgmr.msra.gmra.mxu1 %v1109_v2 }
 0x581   :  { %1962 = vmatpush3.bf16.msra.mxu1 %v2107_v46  ;;  %1977 = vmatprep.mubr.msk.bf16.mxu1 %vm2257_vm4, %v2254_v4 }
 0x582   :  { %1963 = vmatprep.subr.bf16.mxu1 %v2254_v4 }
 0x585   :  { %1964 = vmatpush3.bf16.msra.mxu1 %v2108_v29 }
 0x586   :  { %1965 = vmatprep.subr.bf16.mxu1 %v2254_v4 }
 0x589   :  { %1966 = vmatpush3.bf16.msra.mxu1 %v2109_v47 }
 0x58a   :  { %1967 = vmatprep.subr.bf16.mxu1 %v2254_v4  ;;  %v1566_v51 = vpop.permute.xlu1 %1565 }
 0x58b   :  { %v1562_v50 = vpop.permute.xlu0 %1561 }
 0x58c   :  { %v1588_v53 = vsel %vm539_vm6, %v1525_v34, %v1562_v50 }
 0x58d   :  { %1968 = vmatpush3.bf16.msra.mxu1 %v2110_v49  ;;  %v1589_v56 = vsel %vm183_vm1, %v1588_v53, %v1566_v51 }
 0x58e   :  { %1969 = vmatprep.subr.bf16.mxu1 %v2254_v4  ;;  %v1574_v55 = vpop.permute.xlu1 %1573 }
 0x58f   :  { %v1570_v54 = vpop.permute.xlu0 %1569 }
 0x590   :  { %v1590_v57 = vsel %vm542_vm7, %v1589_v56, %v1570_v54 }
 0x591   :  { %1970 = vmatpush3.bf16.msra.mxu1 %v2111_v52  ;;  %v1591_v61 = vsel %vm185_vm2, %v1590_v57, %v1574_v55 }
 0x592   :  { %1971 = vmatprep.subr.bf16.mxu1 %v2254_v4  ;;  %v1582_v63 = vpop.permute.xlu1 %1581 }
 0x593   :  { %v1578_v58 = vpop.permute.xlu0 %1577 }
 0x594   :  { %v1592_v62 = vsel %vm545_vm8, %v1591_v61, %v1578_v58 }
 0x595   :  { %1972 = vmatpush3.bf16.msra.mxu1 %v2112_v18  ;;  %v1593_v6 = vsel %vm187_vm3, %v1592_v62, %v1582_v63 }
 0x596   :  { %1973 = vmatprep.subr.bf16.mxu1 %v2254_v4 }
 0x597   :  { %v1586_v3 = vpop.permute.xlu0 %1585 }
 0x598   :  { %v1594_v7 = vsel %vm548_vm9, %v1593_v6, %v1586_v3 }
 0x599   :  { %1974 = vmatpush3.bf16.msra.mxu1 %v2113_v60  ;;  %v1595_v8 = vpack.c.bf16 %v1594_v7, %v1594_v7 }
 0x59a   :  { %1975 = vmatprep.subr.bf16.mxu1 %v2254_v4  ;;  %v669_v4 = vadd.f32 %v1759_v14, %v2712_v1 }
 0x59d   :  { %1976 = vmatpush3.bf16.msra.mxu1 %v2114_v5 }
 0x5a0   :  { %1978 = vmatmul.mubr.bf16.vlgmr.msra.gmra.mxu1 %v1595_v8 }
 0x640   :  { %v1227_v9 = vpop.f32.mrf.mxu1 }
 0x641   :  { %v1228_v15 = vadd.f32 %v1811_v13, %v1227_v9 }
 0x642   :  { %v1229_v10 = vpop.f32.mrf.mxu1 }
 0x643   :  { %v1233_v16 = vadd.f32 %v1228_v15, %v669_v4 }
 0x644   :  { %v1230_v11 = vpop.f32.mrf.mxu1 }
 0x646   :  { %v1231_v12 = vpop.f32.mrf.mxu1 }
 0x660   :  { %v1694_v17 = vpop.f32.mrf.mxu1 }
 0x661   :  { %v1700_v19 = vadd.f32 %v1694_v17, %v1233_v16 }
 0x662   :  { %v1979_v20 = vpop.f32.mrf.mxu1 }
 0x663   :  { %1702 = vst.msk [vmem:[#allocation2] sm:$0x3] %vm1701_vm10, %v1700_v19 }
 0x664   :  { %v1697_v21 = vpop.f32.mrf.mxu1 }
 0x665   :  { %2242 = shalt.err (!%p2239_p4)
}
 0x666   :  { %1712 = dma.vmem_to_hbm [thread:$0]  %s1710_s17, 32, %s2890_s23, [#allocation3]   ;;  %v1980_v1 = vpop.f32.mrf.mxu1 }
 0x667   :  { %2251 = dma.done.wait [#allocation3], 32  }
 0x668   :  { %2252 = vsyncadd [#allocation3], 4294967264 }
 0x669   :  { %1716 = vsyncpa [#allocation3], 1 }

</bundles_post_ra>
